<compile_context>
chip_gen: v5e
topology: v5e:2x2
jax: 0.10.0
libtpu: 0.0.40
codegen_flags: <defaults>
</compile_context>

<pallas_src>
import functools
import math

import jax
import jax.numpy as jnp
import numpy as np
from jax import lax
from jax.experimental import pallas as pl
from jax.experimental.pallas import tpu as pltpu


def _round_up(v, m):
    return ((v + m - 1) // m) * m


# ----------------------------------------------------------------------------
# Init-time packing: conv (+ following 2x2/2 max pool) -> one matmul operand.
# ----------------------------------------------------------------------------
def _conv_pool_toeplitz(w, b, in_h, in_w, in_c, pad, channels_first_rows):
    """Pack a stride-1 conv (padding `pad`) + 2x2/2 max-pool as one matmul.

    Rows index the UNPADDED input (structural-zero halo rows are dropped):
      channels_first_rows=True  -> row = ic*(in_h*in_w) + ih*in_w + iw   (NCHW flatten)
      channels_first_rows=False -> row = ih*(in_w*in_c) + iw*in_c + ic   (pooled lane layout)
    Pre-pool column layout: (dh*2+dw)*ncol + ph*(OWP*ocp) + pw*ocp + oc, so the
    pool is a max over 4 contiguous `ncol`-wide lane slices and the pooled
    result has layout ph*(OWP*ocp) + pw*ocp + oc (the next stage's input layout).
    """
    OC, IC, KH, KW = w.shape
    assert IC <= in_c
    OH = in_h + 2 * pad - KH + 1
    OW = in_w + 2 * pad - KW + 1
    assert OH > 0 and OW > 0 and OH % 2 == 0 and OW % 2 == 0
    OHP, OWP = OH // 2, OW // 2
    # Pad OC so the pooled lane width OHP*OWP*ocp is a multiple of 128
    # (128-aligned pool slices, lane-dense unmasked stores).
    step = 128 // math.gcd(OHP * OWP, 128)
    ocp = _round_up(OC, step)
    ncol = OHP * OWP * ocp

    T = np.zeros((in_h * in_w * in_c, 4 * ncol), np.float32)
    for oh in range(OH):
        for ow in range(OW):
            ph, dh = oh // 2, oh % 2
            pw, dw = ow // 2, ow % 2
            col_base = (dh * 2 + dw) * ncol + ph * (OWP * ocp) + pw * ocp
            for kh in range(KH):
                ih = oh + kh - pad
                if ih < 0 or ih >= in_h:
                    continue  # structurally-zero halo row: no Toeplitz entry
                for kw in range(KW):
                    iw = ow + kw - pad
                    if iw < 0 or iw >= in_w:
                        continue
                    for ic in range(IC):
                        if channels_first_rows:
                            row = ic * (in_h * in_w) + ih * in_w + iw
                        else:
                            row = ih * (in_w * in_c) + iw * in_c + ic
                        for oc in range(OC):
                            T[row, col_base + oc] = w[oc, ic, kh, kw]

    oc_of_col = np.arange(4 * ncol) % ocp
    bias_row = np.where(oc_of_col < OC, b[np.minimum(oc_of_col, OC - 1)], 0.0)
    bias_row = bias_row.astype(np.float32)[None, :]
    return T, bias_row, OHP, OWP, ocp


def pack_params(params, *, input_hw, conv1_padding, param_dtype=jnp.bfloat16):
    """One-time repack of PyTorch-layout parameters into fused-kernel operands."""
    f32 = np.float32
    w1 = np.asarray(params["conv1_w"], f32)
    b1 = np.asarray(params["conv1_b"], f32)
    w2 = np.asarray(params["conv2_w"], f32)
    b2 = np.asarray(params["conv2_b"], f32)
    d1w = np.asarray(params["dense1_w"], f32)
    d1b = np.asarray(params["dense1_b"], f32)
    d2w = np.asarray(params["dense2_w"], f32)
    d2b = np.asarray(params["dense2_b"], f32)
    d3w = np.asarray(params["dense3_w"], f32)
    d3b = np.asarray(params["dense3_b"], f32)

    H, W = input_hw
    cin = w1.shape[1]

    # conv1: rows in NCHW-flatten order over the UNPADDED input; padding folded in.
    t1, b1r, ohp1, owp1, ocp1 = _conv_pool_toeplitz(
        w1, b1, H, W, cin, conv1_padding, channels_first_rows=True)
    # conv2: rows in the pooled lane layout produced by stage 1 (padding 0).
    t2, b2r, ohp2, owp2, ocp2 = _conv_pool_toeplitz(
        w2, b2, ohp1, owp1, ocp1, 0, channels_first_rows=False)

    c2 = w2.shape[0]
    d1_out, flat_in = d1w.shape
    assert flat_in == c2 * ohp2 * owp2, (flat_in, c2, ohp2, owp2)
    d2_out, d3_out = d2w.shape[0], d3w.shape[0]
    d1p, d2p, d3p = (_round_up(n, 128) for n in (d1_out, d2_out, d3_out))

    # dense1: permute columns from torch's NCHW-flatten order to the pooled lane
    # order (ph*(OWP*ocp) + pw*ocp + oc), zero rows for padded channels.
    wd1 = np.zeros((ohp2 * owp2 * ocp2, d1p), f32)
    for ph in range(ohp2):
        for pw in range(owp2):
            for oc in range(c2):
                lane = ph * (owp2 * ocp2) + pw * ocp2 + oc
                flat = oc * (ohp2 * owp2) + ph * owp2 + pw
                wd1[lane, :d1_out] = d1w[:, flat]
    wd2 = np.zeros((d1p, d2p), f32)
    wd2[:d1_out, :d2_out] = d2w.T
    wd3 = np.zeros((d2p, d3p), f32)
    wd3[:d2_out, :d3_out] = d3w.T

    def brow(bvec, n, npad):
        r = np.zeros((1, npad), f32)
        r[0, :n] = bvec
        return r

    packed_np = {
        "t1": t1, "b1r": b1r,
        "t2": t2, "b2r": b2r,
        "wd1": wd1, "bd1r": brow(d1b, d1_out, d1p),
        "wd2": wd2, "bd2r": brow(d2b, d2_out, d2p),
        "wd3": wd3, "bd3r": brow(d3b, d3_out, d3p),
    }
    out = {}
    for k, v in packed_np.items():
        dt = jnp.float32 if k.endswith("r") else param_dtype  # biases stay f32
        out[k] = jnp.asarray(v, dtype=dt)
    return out


# ----------------------------------------------------------------------------
# The single fused Pallas kernel.
# ----------------------------------------------------------------------------
def _lenet_fused_kernel(x_ref, t1_ref, b1_ref, t2_ref, b2_ref,
                        wd1_ref, bd1_ref, wd2_ref, bd2_ref, wd3_ref, bd3_ref,
                        out_ref):
    """Whole LeNet forward on one (BM, :) row block; everything stays in VMEM."""

    def mm_bias(a, w_ref, b_ref):
        # bf16 MXU inputs, f32 accumulation, f32 bias add (v5e-safe epilogue).
        return jnp.dot(a.astype(w_ref.dtype), w_ref[...],
                       preferred_element_type=jnp.float32) + b_ref[...]

    def relu(v):
        return jnp.maximum(v, 0.0)

    def pool4(v):
        # 2x2/2 max pool == max of 4 contiguous, 128-aligned lane slices
        # (lane order was arranged at pack time).
        n = v.shape[1] // 4
        return jnp.maximum(jnp.maximum(v[:, 0:n], v[:, n:2 * n]),
                           jnp.maximum(v[:, 2 * n:3 * n], v[:, 3 * n:4 * n]))

    x = x_ref[...]
    p1 = pool4(relu(mm_bias(x, t1_ref, b1_ref)))    # conv1 + relu + pool1
    p2 = pool4(relu(mm_bias(p1, t2_ref, b2_ref)))   # conv2 + relu + pool2
    d1 = relu(mm_bias(p2, wd1_ref, bd1_ref))        # dense1 + relu
    d2 = relu(mm_bias(d1, wd2_ref, bd2_ref))        # dense2 + relu
    out_ref[...] = mm_bias(d2, wd3_ref, bd3_ref).astype(out_ref.dtype)  # dense3


_WEIGHT_ORDER = ("t1", "b1r", "t2", "b2r",
                 "wd1", "bd1r", "wd2", "bd2r", "wd3", "bd3r")


def _lenet_fused_call(x_flat, pk):
    B, kin = x_flat.shape
    if B <= 16:
        # Tiny batch: single grid step, block == full array (no (8,128) rule).
        bm = bp = B
    else:
        # >=2 grid steps so the 'parallel' axis actually splits across v7x's two
        # TensorCores; cap at 256 so each step is at most one full 2x256x256 MXU
        # pass on v6e/v7x and the f32 intermediates stay small in VMEM on v5e.
        # bm is a multiple of 16 (bf16 sublane packing for sub-array blocks).
        bm = min(256, _round_up(-(-B // 2), 16))
        bp = _round_up(B, bm)
    n_out = pk["wd3"].shape[1]
    dtype = pk["t1"].dtype

    # Pad (if any) BEFORE the cast so XLA emits a single fused copy.
    if bp != B:
        x_flat = jnp.pad(x_flat, ((0, bp - B), (0, 0)))
    x_flat = x_flat.astype(dtype)

    # Weight blocks use a constant index map -> fetched once, resident in VMEM.
    # (Total packed weights ~1 MB bf16; optional pl.Buffered(1) not needed.)
    w_specs = [pl.BlockSpec(pk[k].shape, lambda i: (0, 0)) for k in _WEIGHT_ORDER]

    out = pl.pallas_call(
        _lenet_fused_kernel,
        out_shape=jax.ShapeDtypeStruct((bp, n_out), jnp.float32),
        grid=(bp // bm,),
        in_specs=[pl.BlockSpec((bm, kin), lambda i: (i, 0))] + w_specs,
        out_specs=pl.BlockSpec((bm, n_out), lambda i: (i, 0)),
        compiler_params=pltpu.CompilerParams(
            dimension_semantics=("parallel",),   # shard row blocks across TCs (v7x)
        ),
    )(x_flat, *(pk[k] for k in _WEIGHT_ORDER))
    return out[:B]


@functools.partial(jax.jit, static_argnames=("classnum",))
def lenet_forward(x_nchw, packed, *, classnum):
    B = x_nchw.shape[0]
    # Conv1 Toeplitz rows are in NCHW-flatten order over the UNPADDED input, so
    # the only wrapper ops are this reshape and the bf16 cast (fused under jit).
    x_flat = x_nchw.reshape(B, -1)
    logits_padded = _lenet_fused_call(x_flat, packed)
    return logits_padded[:, :classnum]


# ----------------------------------------------------------------------------
# Plain-JAX reference (PyTorch semantics) and synthetic parameters.
# ----------------------------------------------------------------------------
def lenet_reference(x, params):
    hi = lax.Precision.HIGHEST

    def conv(x, w, b, pad):
        y = lax.conv_general_dilated(
            x, w, window_strides=(1, 1), padding=[(pad, pad), (pad, pad)],
            dimension_numbers=("NCHW", "OIHW", "NCHW"), precision=hi)
        return y + b.reshape(1, -1, 1, 1)

    def pool(x):
        return jnp.maximum(
            jnp.maximum(x[:, :, 0::2, 0::2], x[:, :, 0::2, 1::2]),
            jnp.maximum(x[:, :, 1::2, 0::2], x[:, :, 1::2, 1::2]))

    x = pool(jax.nn.relu(conv(x, params["conv1_w"], params["conv1_b"], 2)))
    x = pool(jax.nn.relu(conv(x, params["conv2_w"], params["conv2_b"], 0)))
    x = x.reshape(x.shape[0], -1)
    x = jax.nn.relu(jnp.dot(x, params["dense1_w"].T, precision=hi) + params["dense1_b"])
    x = jax.nn.relu(jnp.dot(x, params["dense2_w"].T, precision=hi) + params["dense2_b"])
    return jnp.dot(x, params["dense3_w"].T, precision=hi) + params["dense3_b"]


def init_params(key):
    """Deterministic synthetic parameters (PyTorch Conv2d/Linear shapes)."""
    ks = jax.random.split(key, 10)

    def nrm(k, shape, scale):
        return (scale * jax.random.normal(k, shape)).astype(jnp.float32)

    conv1_c, conv2_c = 6, 16
    in_c = 1
    d1, d2, classnum = 120, 84, 10
    flat = conv2_c * 2 * 2  # 2x2 spatial after pool2 for a 16x16 input

    return {
        "conv1_w": nrm(ks[0], (conv1_c, in_c, 5, 5), 0.2),
        "conv1_b": nrm(ks[1], (conv1_c,), 0.1),
        "conv2_w": nrm(ks[2], (conv2_c, conv1_c, 5, 5), 0.1),
        "conv2_b": nrm(ks[3], (conv2_c,), 0.1),
        "dense1_w": nrm(ks[4], (d1, flat), 0.1),   # (out, in) like nn.Linear
        "dense1_b": nrm(ks[5], (d1,), 0.1),
        "dense2_w": nrm(ks[6], (d2, d1), 0.1),
        "dense2_b": nrm(ks[7], (d2,), 0.1),
        "dense3_w": nrm(ks[8], (classnum, d2), 0.1),
        "dense3_b": nrm(ks[9], (classnum,), 0.1),
    }


if __name__ == "__main__":
    key = jax.random.PRNGKey(0)
    k_x, k_p = jax.random.split(key)

    # Small LeNet-style input: batch=2, channels=1, 16x16 spatial (NCHW).
    x = jax.random.normal(k_x, (2, 1, 16, 16), dtype=jnp.float32)
    params = init_params(k_p)

    # One-time weight repack (hoisted out of the jitted forward).
    packed = pack_params(params, input_hw=(16, 16), conv1_padding=2)

    out = lenet_forward(x, packed, classnum=10)
    out = jax.block_until_ready(out)

    assert out.shape == (2, 10), out.shape
    assert bool(jnp.all(jnp.isfinite(out)))

    # Numerical check vs plain-JAX reference (bf16 matmul inputs -> loose tolerance).
    ref = lenet_reference(x, params)
    err = float(jnp.max(jnp.abs(out - ref)))
    assert err < 1e-1, f"max abs error vs reference: {err}"

    print("KERNEL_OK")
</pallas_src>

<mosaic_0001>
module attributes {stable_mosaic.version = 11 : i64} {
  func.func @_lenet_fused_kernel(%arg0: i32, %arg1: memref<2x256xbf16, #tpu.memory_space<vmem>>, %arg2: memref<256x1536xbf16, #tpu.memory_space<vmem>>, %arg3: memref<1x1536xf32, #tpu.memory_space<vmem>>, %arg4: memref<384x512xbf16, #tpu.memory_space<vmem>>, %arg5: memref<1x512xf32, #tpu.memory_space<vmem>>, %arg6: memref<128x128xbf16, #tpu.memory_space<vmem>>, %arg7: memref<1x128xf32, #tpu.memory_space<vmem>>, %arg8: memref<128x128xbf16, #tpu.memory_space<vmem>>, %arg9: memref<1x128xf32, #tpu.memory_space<vmem>>, %arg10: memref<128x128xbf16, #tpu.memory_space<vmem>>, %arg11: memref<1x128xf32, #tpu.memory_space<vmem>>, %arg12: memref<2x128xf32, #tpu.memory_space<vmem>>) attributes {dimension_semantics = [#tpu.dimension_semantics<parallel>], iteration_bounds = array<i64: 1>, scalar_prefetch = 0 : i64, scratch_operands = 0 : i64, tpu.core_type = #tpu.core_type<tc>, window_params = [{transform_indices = @transform_0, window_bounds = array<i64: 2, 256>}, {pipeline_mode = #tpu.pipeline_mode<synchronous>, transform_indices = @transform_1, window_bounds = array<i64: 256, 1536>}, {pipeline_mode = #tpu.pipeline_mode<synchronous>, transform_indices = @transform_2, window_bounds = array<i64: 1, 1536>}, {pipeline_mode = #tpu.pipeline_mode<synchronous>, transform_indices = @transform_3, window_bounds = array<i64: 384, 512>}, {pipeline_mode = #tpu.pipeline_mode<synchronous>, transform_indices = @transform_4, window_bounds = array<i64: 1, 512>}, {pipeline_mode = #tpu.pipeline_mode<synchronous>, transform_indices = @transform_5, window_bounds = array<i64: 128, 128>}, {pipeline_mode = #tpu.pipeline_mode<synchronous>, transform_indices = @transform_6, window_bounds = array<i64: 1, 128>}, {pipeline_mode = #tpu.pipeline_mode<synchronous>, transform_indices = @transform_7, window_bounds = array<i64: 128, 128>}, {pipeline_mode = #tpu.pipeline_mode<synchronous>, transform_indices = @transform_8, window_bounds = array<i64: 1, 128>}, {pipeline_mode = #tpu.pipeline_mode<synchronous>, transform_indices = @transform_9, window_bounds = array<i64: 128, 128>}, {pipeline_mode = #tpu.pipeline_mode<synchronous>, transform_indices = @transform_10, window_bounds = array<i64: 1, 128>}, {transform_indices = @transform_11, window_bounds = array<i64: 2, 128>}]} {
    %c0 = arith.constant 0 : index
    %c0_0 = arith.constant 0 : index
    %0 = vector.load %arg1[%c0, %c0_0] : memref<2x256xbf16, #tpu.memory_space<vmem>>, vector<2x256xbf16>
    %c0_1 = arith.constant 0 : index
    %c0_2 = arith.constant 0 : index
    %1 = vector.load %arg2[%c0_1, %c0_2] : memref<256x1536xbf16, #tpu.memory_space<vmem>>, vector<256x1536xbf16>
    %cst = arith.constant dense<0.000000e+00> : vector<2x1536xf32>
    %2 = tpu.matmul %0, %1, %cst {dimension_numbers = #tpu.dot_dimension_numbers<[1], [0], [0], [1], [0, 0, 1, 1], [], []>} : vector<2x256xbf16>, vector<256x1536xbf16>, vector<2x1536xf32> -> vector<2x1536xf32>
    %c0_3 = arith.constant 0 : index
    %c0_4 = arith.constant 0 : index
    %3 = vector.load %arg3[%c0_3, %c0_4] : memref<1x1536xf32, #tpu.memory_space<vmem>>, vector<1x1536xf32>
    %4 = vector.broadcast %3 : vector<1x1536xf32> to vector<2x1536xf32>
    %5 = arith.addf %2, %4 : vector<2x1536xf32>
    %cst_5 = arith.constant 0.000000e+00 : f32
    %6 = vector.broadcast %cst_5 : f32 to vector<2x1536xf32>
    %7 = arith.maximumf %5, %6 : vector<2x1536xf32>
    %8 = vector.extract_strided_slice %7 {offsets = [0, 0], sizes = [2, 384], strides = [1, 1]} : vector<2x1536xf32> to vector<2x384xf32>
    %9 = vector.extract_strided_slice %7 {offsets = [0, 384], sizes = [2, 384], strides = [1, 1]} : vector<2x1536xf32> to vector<2x384xf32>
    %10 = arith.maximumf %8, %9 : vector<2x384xf32>
    %11 = vector.extract_strided_slice %7 {offsets = [0, 768], sizes = [2, 384], strides = [1, 1]} : vector<2x1536xf32> to vector<2x384xf32>
    %12 = vector.extract_strided_slice %7 {offsets = [0, 1152], sizes = [2, 384], strides = [1, 1]} : vector<2x1536xf32> to vector<2x384xf32>
    %13 = arith.maximumf %11, %12 : vector<2x384xf32>
    %14 = arith.maximumf %10, %13 : vector<2x384xf32>
    %15 = arith.truncf %14 : vector<2x384xf32> to vector<2x384xbf16>
    %c0_6 = arith.constant 0 : index
    %c0_7 = arith.constant 0 : index
    %16 = vector.load %arg4[%c0_6, %c0_7] : memref<384x512xbf16, #tpu.memory_space<vmem>>, vector<384x512xbf16>
    %cst_8 = arith.constant dense<0.000000e+00> : vector<2x512xf32>
    %17 = tpu.matmul %15, %16, %cst_8 {dimension_numbers = #tpu.dot_dimension_numbers<[1], [0], [0], [1], [0, 0, 1, 1], [], []>} : vector<2x384xbf16>, vector<384x512xbf16>, vector<2x512xf32> -> vector<2x512xf32>
    %c0_9 = arith.constant 0 : index
    %c0_10 = arith.constant 0 : index
    %18 = vector.load %arg5[%c0_9, %c0_10] : memref<1x512xf32, #tpu.memory_space<vmem>>, vector<1x512xf32>
    %19 = vector.broadcast %18 : vector<1x512xf32> to vector<2x512xf32>
    %20 = arith.addf %17, %19 : vector<2x512xf32>
    %cst_11 = arith.constant 0.000000e+00 : f32
    %21 = vector.broadcast %cst_11 : f32 to vector<2x512xf32>
    %22 = arith.maximumf %20, %21 : vector<2x512xf32>
    %23 = vector.extract_strided_slice %22 {offsets = [0, 0], sizes = [2, 128], strides = [1, 1]} : vector<2x512xf32> to vector<2x128xf32>
    %24 = vector.extract_strided_slice %22 {offsets = [0, 128], sizes = [2, 128], strides = [1, 1]} : vector<2x512xf32> to vector<2x128xf32>
    %25 = arith.maximumf %23, %24 : vector<2x128xf32>
    %26 = vector.extract_strided_slice %22 {offsets = [0, 256], sizes = [2, 128], strides = [1, 1]} : vector<2x512xf32> to vector<2x128xf32>
    %27 = vector.extract_strided_slice %22 {offsets = [0, 384], sizes = [2, 128], strides = [1, 1]} : vector<2x512xf32> to vector<2x128xf32>
    %28 = arith.maximumf %26, %27 : vector<2x128xf32>
    %29 = arith.maximumf %25, %28 : vector<2x128xf32>
    %30 = arith.truncf %29 : vector<2x128xf32> to vector<2x128xbf16>
    %c0_12 = arith.constant 0 : index
    %c0_13 = arith.constant 0 : index
    %31 = vector.load %arg6[%c0_12, %c0_13] : memref<128x128xbf16, #tpu.memory_space<vmem>>, vector<128x128xbf16>
    %cst_14 = arith.constant dense<0.000000e+00> : vector<2x128xf32>
    %32 = tpu.matmul %30, %31, %cst_14 {dimension_numbers = #tpu.dot_dimension_numbers<[1], [0], [0], [1], [0, 0, 1, 1], [], []>} : vector<2x128xbf16>, vector<128x128xbf16>, vector<2x128xf32> -> vector<2x128xf32>
    %c0_15 = arith.constant 0 : index
    %c0_16 = arith.constant 0 : index
    %33 = vector.load %arg7[%c0_15, %c0_16] : memref<1x128xf32, #tpu.memory_space<vmem>>, vector<1x128xf32>
    %34 = vector.broadcast %33 : vector<1x128xf32> to vector<2x128xf32>
    %35 = arith.addf %32, %34 : vector<2x128xf32>
    %cst_17 = arith.constant 0.000000e+00 : f32
    %36 = vector.broadcast %cst_17 : f32 to vector<2x128xf32>
    %37 = arith.maximumf %35, %36 : vector<2x128xf32>
    %38 = arith.truncf %37 : vector<2x128xf32> to vector<2x128xbf16>
    %c0_18 = arith.constant 0 : index
    %c0_19 = arith.constant 0 : index
    %39 = vector.load %arg8[%c0_18, %c0_19] : memref<128x128xbf16, #tpu.memory_space<vmem>>, vector<128x128xbf16>
    %cst_20 = arith.constant dense<0.000000e+00> : vector<2x128xf32>
    %40 = tpu.matmul %38, %39, %cst_20 {dimension_numbers = #tpu.dot_dimension_numbers<[1], [0], [0], [1], [0, 0, 1, 1], [], []>} : vector<2x128xbf16>, vector<128x128xbf16>, vector<2x128xf32> -> vector<2x128xf32>
    %c0_21 = arith.constant 0 : index
    %c0_22 = arith.constant 0 : index
    %41 = vector.load %arg9[%c0_21, %c0_22] : memref<1x128xf32, #tpu.memory_space<vmem>>, vector<1x128xf32>
    %42 = vector.broadcast %41 : vector<1x128xf32> to vector<2x128xf32>
    %43 = arith.addf %40, %42 : vector<2x128xf32>
    %cst_23 = arith.constant 0.000000e+00 : f32
    %44 = vector.broadcast %cst_23 : f32 to vector<2x128xf32>
    %45 = arith.maximumf %43, %44 : vector<2x128xf32>
    %46 = arith.truncf %45 : vector<2x128xf32> to vector<2x128xbf16>
    %c0_24 = arith.constant 0 : index
    %c0_25 = arith.constant 0 : index
    %47 = vector.load %arg10[%c0_24, %c0_25] : memref<128x128xbf16, #tpu.memory_space<vmem>>, vector<128x128xbf16>
    %cst_26 = arith.constant dense<0.000000e+00> : vector<2x128xf32>
    %48 = tpu.matmul %46, %47, %cst_26 {dimension_numbers = #tpu.dot_dimension_numbers<[1], [0], [0], [1], [0, 0, 1, 1], [], []>} : vector<2x128xbf16>, vector<128x128xbf16>, vector<2x128xf32> -> vector<2x128xf32>
    %c0_27 = arith.constant 0 : index
    %c0_28 = arith.constant 0 : index
    %49 = vector.load %arg11[%c0_27, %c0_28] : memref<1x128xf32, #tpu.memory_space<vmem>>, vector<1x128xf32>
    %50 = vector.broadcast %49 : vector<1x128xf32> to vector<2x128xf32>
    %51 = arith.addf %48, %50 : vector<2x128xf32>
    %c0_29 = arith.constant 0 : index
    %c0_30 = arith.constant 0 : index
    %52 = vector.load %arg12[%c0_29, %c0_30] : memref<2x128xf32, #tpu.memory_space<vmem>>, vector<2x128xf32>
    tpu.vector_store %arg12[%c0_29, %c0_30], %51 {strides = array<i32>} : memref<2x128xf32, #tpu.memory_space<vmem>>, vector<2x128xf32>,
    return
  }
  func.func @transform_0(%arg0: i32) -> (i32, i32) {
    %c0_i32 = arith.constant 0 : i32
    %c0_i32_0 = arith.constant 0 : i32
    return %arg0, %c0_i32 : i32, i32
  }
  func.func @transform_1(%arg0: i32) -> (i32, i32) {
    %c0_i32 = arith.constant 0 : i32
    %c0_i32_0 = arith.constant 0 : i32
    %c0_i32_1 = arith.constant 0 : i32
    return %c0_i32, %c0_i32_0 : i32, i32
  }
  func.func @transform_2(%arg0: i32) -> (i32, i32) {
    %c0_i32 = arith.constant 0 : i32
    %c0_i32_0 = arith.constant 0 : i32
    %c0_i32_1 = arith.constant 0 : i32
    return %c0_i32, %c0_i32_0 : i32, i32
  }
  func.func @transform_3(%arg0: i32) -> (i32, i32) {
    %c0_i32 = arith.constant 0 : i32
    %c0_i32_0 = arith.constant 0 : i32
    %c0_i32_1 = arith.constant 0 : i32
    return %c0_i32, %c0_i32_0 : i32, i32
  }
  func.func @transform_4(%arg0: i32) -> (i32, i32) {
    %c0_i32 = arith.constant 0 : i32
    %c0_i32_0 = arith.constant 0 : i32
    %c0_i32_1 = arith.constant 0 : i32
    return %c0_i32, %c0_i32_0 : i32, i32
  }
  func.func @transform_5(%arg0: i32) -> (i32, i32) {
    %c0_i32 = arith.constant 0 : i32
    %c0_i32_0 = arith.constant 0 : i32
    %c0_i32_1 = arith.constant 0 : i32
    return %c0_i32, %c0_i32_0 : i32, i32
  }
  func.func @transform_6(%arg0: i32) -> (i32, i32) {
    %c0_i32 = arith.constant 0 : i32
    %c0_i32_0 = arith.constant 0 : i32
    %c0_i32_1 = arith.constant 0 : i32
    return %c0_i32, %c0_i32_0 : i32, i32
  }
  func.func @transform_7(%arg0: i32) -> (i32, i32) {
    %c0_i32 = arith.constant 0 : i32
    %c0_i32_0 = arith.constant 0 : i32
    %c0_i32_1 = arith.constant 0 : i32
    return %c0_i32, %c0_i32_0 : i32, i32
  }
  func.func @transform_8(%arg0: i32) -> (i32, i32) {
    %c0_i32 = arith.constant 0 : i32
    %c0_i32_0 = arith.constant 0 : i32
    %c0_i32_1 = arith.constant 0 : i32
    return %c0_i32, %c0_i32_0 : i32, i32
  }
  func.func @transform_9(%arg0: i32) -> (i32, i32) {
    %c0_i32 = arith.constant 0 : i32
    %c0_i32_0 = arith.constant 0 : i32
    %c0_i32_1 = arith.constant 0 : i32
    return %c0_i32, %c0_i32_0 : i32, i32
  }
  func.func @transform_10(%arg0: i32) -> (i32, i32) {
    %c0_i32 = arith.constant 0 : i32
    %c0_i32_0 = arith.constant 0 : i32
    %c0_i32_1 = arith.constant 0 : i32
    return %c0_i32, %c0_i32_0 : i32, i32
  }
  func.func @transform_11(%arg0: i32) -> (i32, i32) {
    %c0_i32 = arith.constant 0 : i32
    %c0_i32_0 = arith.constant 0 : i32
    return %arg0, %c0_i32 : i32, i32
  }
}

</mosaic_0001>

<bundles_post_ra>
// kernel: lenet_forward.1
= control target key start
LH: loop header
LB: loop body
LE: loop exit
PB: predicated region body
PF: predicated region fallthrough
CT: control target
= control target key end

     0   :  { %16 = vsyncpa [#allocation3], 0  ;;  %s4606_s0 = inlined_call_operand.vmem [shape: bf16[2,256], index: 0, kind: input, shape index: {}]   ;;  %s4607_s1 = inlined_call_operand.hbm [shape: bf16[256,1536], index: 1, kind: input, shape index: {}]   ;;  %s4608_s2 = inlined_call_operand.hbm [shape: f32[1,1536], index: 2, kind: input, shape index: {}]   ;;  %s4609_s3 = inlined_call_operand.hbm [shape: bf16[384,512], index: 3, kind: input, shape index: {}]   ;;  %s4610_s4 = inlined_call_operand.vmem [shape: f32[1,512], index: 4, kind: input, shape index: {}]   ;;  %s4611_s5 = inlined_call_operand.vmem [shape: bf16[128,128], index: 5, kind: input, shape index: {}]   ;;  %s4612_s6 = inlined_call_operand.vmem [shape: f32[1,128], index: 6, kind: input, shape index: {}]   ;;  %s4613_s7 = inlined_call_operand.hbm [shape: bf16[128,128], index: 7, kind: input, shape index: {}]   ;;  %s4614_s8 = inlined_call_operand.vmem [shape: f32[1,128], index: 8, kind: input, shape index: {}]   ;;  %s4615_s9 = inlined_call_operand.hbm [shape: bf16[128,128], index: 9, kind: input, shape index: {}]   ;;  %s4616_s10 = inlined_call_operand.vmem [shape: f32[1,128], index: 10, kind: input, shape index: {}]   ;;  %s4617_s11 = inlined_call_operand.hbm [shape: f32[2,128], index: 11, kind: output, shape index: {}]  }
   0x1   :  { %17 = vsyncpa [#allocation6], 0 }
   0x2   :  { %18 = vsyncpa [#allocation9], 0  ;;  %s40_s19 = sshll.u32 %s4608_s2, 4  ;;  %s41_s19 = int_to_ptr.hbm [resolvable:$true] %s40_s19 }
   0x3   :  { %19 = vsyncpa [#allocation4], 0  ;;  %s4384_s20 = smov [#allocation5]   ;;  %s69_s24 = sshll.u32 %s4613_s7, 4  ;;  %s70_s24 = int_to_ptr.hbm [resolvable:$true] %s69_s24 }
   0x4   :  { %s42_s21 = sshll.u32 %s4384_s20, 4  ;;  %s4385_s25 = smov [#allocation8]   ;;  %s43_s21 = int_to_ptr.vmem [resolvable:$true] %s42_s21 }
   0x5   :  { %45 = dma.hbm_to_vmem [thread:$0]  %s41_s19, 192, %s43_s21, [#allocation6]  }
   0x6   :  { %s71_s26 = sshll.u32 %s4385_s25, 4  ;;  %s4386_s27 = smov 64   ;;  %s72_s26 = int_to_ptr.vmem [resolvable:$true] %s71_s26 }
   0x7   :  { %s4387_s28 = smov 4   ;;  %s26_s2 = sshll.u32 %s4607_s1, 4  ;;  %s27_s2 = int_to_ptr.hbm [resolvable:$true] %s26_s2 }
   0x8   :  { %77 = dma.hbm_to_vmem [thread:$0]  %s70_s24, 1024, %s72_s26, [#allocation9], %s4386_s27, %s4386_s27, %s4387_s28  }
   0x9   :  { %s4388_s12 = smov [#allocation2]   ;;  %s50_s7 = sshll.u32 %s4609_s3, 4  ;;  %s51_s7 = int_to_ptr.hbm [resolvable:$true] %s50_s7 }
   0xa   :  { %s28_s13 = sshll.u32 %s4388_s12, 4  ;;  %s4389_s16 = smov 768   ;;  %s29_s13 = int_to_ptr.vmem [resolvable:$true] %s28_s13 }
   0xb   :  { %s4390_s17 = smov 48   ;;  %s4391_s18 = smov [#allocation7]  }
   0xc   :  { %34 = dma.hbm_to_vmem [thread:$0]  %s27_s2, 24576, %s29_s13, [#allocation3], %s4389_s16, %s4389_s16, %s4390_s17  }
   0xd   :  { %s52_s19 = sshll.u32 %s4391_s18, 4  ;;  %s4392_s20 = smov 256   ;;  %s53_s19 = int_to_ptr.vmem [resolvable:$true] %s52_s19 }
   0xe   :  { %s4393_s21 = smov 16   ;;  %s84_s23 = sshll.u32 %s4615_s9, 4  ;;  %s85_s23 = int_to_ptr.hbm [resolvable:$true] %s84_s23 }
   0xf   :  { %58 = dma.hbm_to_vmem [thread:$0]  %s51_s7, 12288, %s53_s19, [#allocation6], %s4392_s20, %s4392_s20, %s4393_s21  }
  0x10   :  { %s4394_s24 = smov [#allocation10]  }
  0x11   :  { %s86_s25 = sshll.u32 %s4394_s24, 4  ;;  %s87_s25 = int_to_ptr.vmem [resolvable:$true] %s86_s25 }
  0x12   :  { %92 = dma.hbm_to_vmem [thread:$0]  %s85_s23, 1024, %s87_s25, [#allocation9], %s4386_s27, %s4386_s27, %s4387_s28  }
  0x13   :  { %4376 = dma.done.wait [#allocation3], 24576  }
  0x14   :  { %4377 = vsyncadd [#allocation3], 4294942720 }
  0x15   :  { %4378 = dma.done.wait [#allocation6], 12480  }
  0x16   :  { %4379 = vsyncadd [#allocation6], 4294954816 }
  0x17   :  { %4380 = dma.done.wait [#allocation9], 2048  }
  0x18   :  { %4381 = vsyncadd [#allocation9], 4294965248  ;;  %v2993_v0 = vld [vmem:[#allocation2 + $0x2a0] sm:$0xf]  ;;  %v3993_v1 = vld [vmem:[#allocation2 + $0x2cc] sm:$0xf0] }
  0x19   :  { %v3987_v2 = vld [vmem:[#allocation2 + $0x2a4] sm:$0xf]  ;;  %v2994_v3 = vor.u32 %v3993_v1, %v2993_v0  ;;  %v2995_v4 = vld [vmem:[#allocation2 + $0x2d0] sm:$0xf0]  ;;  %v3377_v9 = vld [vmem:[#allocation2 + $0x5a0] sm:$0xf] }
  0x1a   :  { %v4083_v5 = vld [vmem:[#allocation2 + $0x5a4] sm:$0xf]  ;;  %v3379_v6 = vld [vmem:[#allocation2 + $0x5d0] sm:$0xf0]  ;;  %v2998_v7 = vor.u32 %v3987_v2, %v2995_v4  ;;  %v4089_v10 = vld [vmem:[#allocation2 + $0x5cc] sm:$0xf0] }
  0x1b   :  { %v3382_v8 = vor.u32 %v4083_v5, %v3379_v6  ;;  %v2945_v11 = vld [vmem:[#allocation2 + $0x240] sm:$0xf]  ;;  %1302 = vmatpush.bf16.msra.mxu0 %v2994_v3  ;;  %v3378_v12 = vor.u32 %v4089_v10, %v3377_v9  ;;  %v3981_v13 = vld [vmem:[#allocation2 + $0x26c] sm:$0xf0]  ;;  %v3975_v14 = vld [vmem:[#allocation2 + $0x244] sm:$0xf] }
  0x1c   :  { %v2947_v15 = vld [vmem:[#allocation2 + $0x270] sm:$0xf0]  ;;  %1328 = vmatpush.bf16.msra.mxu2 %v2998_v7  ;;  %v2946_v16 = vor.u32 %v3981_v13, %v2945_v11  ;;  %v4071_v18 = vld [vmem:[#allocation2 + $0x544] sm:$0xf]  ;;  %v3329_v20 = vld [vmem:[#allocation2 + $0x540] sm:$0xf] }
  0x1d   :  { %1341 = vmatpush.bf16.msra.mxu3 %v3382_v8  ;;  %v2950_v17 = vor.u32 %v3975_v14, %v2947_v15  ;;  %v3331_v19 = vld [vmem:[#allocation2 + $0x570] sm:$0xf0]  ;;  %1315 = vmatpush.bf16.msra.mxu1 %v3378_v12  ;;  %v4077_v22 = vld [vmem:[#allocation2 + $0x56c] sm:$0xf0]  ;;  %v2897_v23 = vld [vmem:[#allocation2 + $0x1e0] sm:$0xf] }
  0x1e   :  { %v3334_v21 = vor.u32 %v4071_v18, %v3331_v19  ;;  %v3969_v24 = vld [vmem:[#allocation2 + $0x20c] sm:$0xf0]  ;;  %v3330_v25 = vor.u32 %v4077_v22, %v3329_v20  ;;  %v3963_v26 = vld [vmem:[#allocation2 + $0x1e4] sm:$0xf]  ;;  %v2899_v27 = vld [vmem:[#allocation2 + $0x210] sm:$0xf0] }
  0x1f   :  { %v4059_v28 = vld [vmem:[#allocation2 + $0x4e4] sm:$0xf]  ;;  %1303 = vmatpush.bf16.msra.mxu0 %v2946_v16  ;;  %v2898_v29 = vor.u32 %v3969_v24, %v2897_v23  ;;  %v3283_v30 = vld [vmem:[#allocation2 + $0x510] sm:$0xf0]  ;;  %v3281_v31 = vld [vmem:[#allocation2 + $0x4e0] sm:$0xf]  ;;  %v2902_v33 = vor.u32 %v3963_v26, %v2899_v27 }
  0x20   :  { %v4065_v32 = vld [vmem:[#allocation2 + $0x50c] sm:$0xf0]  ;;  %1329 = vmatpush.bf16.msra.mxu2 %v2950_v17  ;;  %v3286_v34 = vor.u32 %v4059_v28, %v3283_v30  ;;  %v2849_v35 = vld [vmem:[#allocation2 + $0x180] sm:$0xf]  ;;  %v3951_v37 = vld [vmem:[#allocation2 + $0x184] sm:$0xf] }
  0x21   :  { %1342 = vmatpush.bf16.msra.mxu3 %v3334_v21  ;;  %v3957_v36 = vld [vmem:[#allocation2 + $0x1ac] sm:$0xf0]  ;;  %1316 = vmatpush.bf16.msra.mxu1 %v3330_v25  ;;  %v3282_v38 = vor.u32 %v4065_v32, %v3281_v31  ;;  %v2851_v39 = vld [vmem:[#allocation2 + $0x1b0] sm:$0xf0]  ;;  %v4047_v40 = vld [vmem:[#allocation2 + $0x484] sm:$0xf] }
  0x22   :  { %v3235_v41 = vld [vmem:[#allocation2 + $0x4b0] sm:$0xf0]  ;;  %v3233_v42 = vld [vmem:[#allocation2 + $0x480] sm:$0xf]  ;;  %v4053_v43 = vld [vmem:[#allocation2 + $0x4ac] sm:$0xf0]  ;;  %v2850_v44 = vor.u32 %v3957_v36, %v2849_v35  ;;  %v2854_v45 = vor.u32 %v3951_v37, %v2851_v39 }
  0x23   :  { %1304 = vmatpush.bf16.msra.mxu0 %v2898_v29  ;;  %v3238_v46 = vor.u32 %v4047_v40, %v3235_v41  ;;  %v2801_v47 = vld [vmem:[#allocation2 + $0x120] sm:$0xf]  ;;  %v3945_v48 = vld [vmem:[#allocation2 + $0x14c] sm:$0xf0]  ;;  %v3939_v49 = vld [vmem:[#allocation2 + $0x124] sm:$0xf]  ;;  %v3234_v50 = vor.u32 %v4053_v43, %v3233_v42 }
  0x24   :  { %1330 = vmatpush.bf16.msra.mxu2 %v2902_v33  ;;  %v2803_v51 = vld [vmem:[#allocation2 + $0x150] sm:$0xf0]  ;;  %v4035_v52 = vld [vmem:[#allocation2 + $0x424] sm:$0xf]  ;;  %v3185_v54 = vld [vmem:[#allocation2 + $0x420] sm:$0xf]  ;;  %v2802_v56 = vor.u32 %v3945_v48, %v2801_v47 }
  0x25   :  { %1343 = vmatpush.bf16.msra.mxu3 %v3286_v34  ;;  %1317 = vmatpush.bf16.msra.mxu1 %v3282_v38  ;;  %v3187_v53 = vld [vmem:[#allocation2 + $0x450] sm:$0xf0]  ;;  %v4041_v55 = vld [vmem:[#allocation2 + $0x44c] sm:$0xf0]  ;;  %v2806_v57 = vor.u32 %v3939_v49, %v2803_v51  ;;  %v2753_v59 = vld [vmem:[#allocation2 + $0xc0] sm:$0xf] }
  0x26   :  { %v3190_v58 = vor.u32 %v4035_v52, %v3187_v53  ;;  %v3933_v60 = vld [vmem:[#allocation2 + $0xec] sm:$0xf0]  ;;  %v3927_v61 = vld [vmem:[#allocation2 + $0xc4] sm:$0xf]  ;;  %v3186_v62 = vor.u32 %v4041_v55, %v3185_v54  ;;  %v2755_v63 = vld [vmem:[#allocation2 + $0xf0] sm:$0xf0] }
  0x27   :  { %1305 = vmatpush.bf16.msra.mxu0 %v2850_v44  ;;  %v4023_v0 = vld [vmem:[#allocation2 + $0x3c4] sm:$0xf]  ;;  %v3139_v1 = vld [vmem:[#allocation2 + $0x3f0] sm:$0xf0]  ;;  %v3137_v2 = vld [vmem:[#allocation2 + $0x3c0] sm:$0xf]  ;;  %v2754_v4 = vor.u32 %v3933_v60, %v2753_v59  ;;  %v2758_v5 = vor.u32 %v3927_v61, %v2755_v63 }
  0x28   :  { %1331 = vmatpush.bf16.msra.mxu2 %v2854_v45  ;;  %v4029_v3 = vld [vmem:[#allocation2 + $0x3ec] sm:$0xf0]  ;;  %v3142_v6 = vor.u32 %v4023_v0, %v3139_v1  ;;  %v2705_v7 = vld [vmem:[#allocation2 + $0x60] sm:$0xf]  ;;  %v3915_v9 = vld [vmem:[#allocation2 + $0x64] sm:$0xf] }
  0x29   :  { %1344 = vmatpush.bf16.msra.mxu3 %v3238_v46  ;;  %1318 = vmatpush.bf16.msra.mxu1 %v3234_v50  ;;  %v3921_v8 = vld [vmem:[#allocation2 + $0x8c] sm:$0xf0]  ;;  %v3138_v10 = vor.u32 %v4029_v3, %v3137_v2  ;;  %v2707_v11 = vld [vmem:[#allocation2 + $0x90] sm:$0xf0]  ;;  %v4011_v12 = vld [vmem:[#allocation2 + $0x364] sm:$0xf] }
  0x2a   :  { %v3091_v13 = vld [vmem:[#allocation2 + $0x390] sm:$0xf0]  ;;  %v3089_v14 = vld [vmem:[#allocation2 + $0x360] sm:$0xf]  ;;  %v4017_v15 = vld [vmem:[#allocation2 + $0x38c] sm:$0xf0]  ;;  %v2706_v16 = vor.u32 %v3921_v8, %v2705_v7  ;;  %v2710_v19 = vor.u32 %v3915_v9, %v2707_v11 }
  0x2b   :  { %1306 = vmatpush.bf16.msra.mxu0 %v2802_v56  ;;  %v2657_v17 = vld [vmem:[#allocation2] sm:$0xf]  ;;  %v3909_v18 = vld [vmem:[#allocation2 + $0x2c] sm:$0xf0]  ;;  %v3094_v20 = vor.u32 %v4011_v12, %v3091_v13  ;;  %v3903_v21 = vld [vmem:[#allocation2 + $0x4] sm:$0xf]  ;;  %v3090_v24 = vor.u32 %v4017_v15, %v3089_v14 }
  0x2c   :  { %1332 = vmatpush.bf16.msra.mxu2 %v2806_v57  ;;  %v2659_v22 = vld [vmem:[#allocation2 + $0x30] sm:$0xf0]  ;;  %v3999_v23 = vld [vmem:[#allocation2 + $0x304] sm:$0xf]  ;;  %v3001_v26 = vld [vmem:[#allocation2 + $0x2a8] sm:$0xf]  ;;  %v2658_v31 = vor.u32 %v3909_v18, %v2657_v17 }
  0x2d   :  { %1345 = vmatpush.bf16.msra.mxu3 %v3190_v58  ;;  %1319 = vmatpush.bf16.msra.mxu1 %v3186_v62  ;;  %v3043_v25 = vld [vmem:[#allocation2 + $0x330] sm:$0xf0]  ;;  %v3994_v27 = vld [vmem:[#allocation2 + $0x2d4] sm:$0xf0]  ;;  %v3988_v28 = vld [vmem:[#allocation2 + $0x2ac] sm:$0xf]  ;;  %v2662_v35 = vor.u32 %v3903_v21, %v2659_v22 }
  0x2e   :  { %v3003_v29 = vld [vmem:[#allocation2 + $0x2d8] sm:$0xf0]  ;;  %v4084_v30 = vld [vmem:[#allocation2 + $0x5ac] sm:$0xf]  ;;  %v3041_v33 = vld [vmem:[#allocation2 + $0x300] sm:$0xf]  ;;  %v3046_v36 = vor.u32 %v3999_v23, %v3043_v25  ;;  %v3002_v39 = vor.u32 %v3994_v27, %v3001_v26 }
  0x2f   :  { %1307 = vmatpush.bf16.msra.mxu0 %v2754_v4  ;;  %v3387_v32 = vld [vmem:[#allocation2 + $0x5d8] sm:$0xf0]  ;;  %v4005_v34 = vld [vmem:[#allocation2 + $0x32c] sm:$0xf0]  ;;  %v3385_v37 = vld [vmem:[#allocation2 + $0x5a8] sm:$0xf]  ;;  %v3006_v40 = vor.u32 %v3988_v28, %v3003_v29 }
  0x30   :  { %1333 = vmatpush.bf16.msra.mxu2 %v2758_v5  ;;  %v4090_v38 = vld [vmem:[#allocation2 + $0x5d4] sm:$0xf0]  ;;  %v2953_v41 = vld [vmem:[#allocation2 + $0x248] sm:$0xf]  ;;  %v3390_v42 = vor.u32 %v4084_v30, %v3387_v32  ;;  %v3042_v43 = vor.u32 %v4005_v34, %v3041_v33  ;;  %v3976_v45 = vld [vmem:[#allocation2 + $0x24c] sm:$0xf] }
  0x31   :  { %1346 = vmatpush.bf16.msra.mxu3 %v3142_v6  ;;  %1320 = vmatpush.bf16.msra.mxu1 %v3138_v10  ;;  %v3982_v44 = vld [vmem:[#allocation2 + $0x274] sm:$0xf0]  ;;  %v2955_v46 = vld [vmem:[#allocation2 + $0x278] sm:$0xf0]  ;;  %v3386_v47 = vor.u32 %v4090_v38, %v3385_v37  ;;  %v4072_v48 = vld [vmem:[#allocation2 + $0x54c] sm:$0xf] }
  0x32   :  { %v3339_v49 = vld [vmem:[#allocation2 + $0x578] sm:$0xf0]  ;;  %v3337_v50 = vld [vmem:[#allocation2 + $0x548] sm:$0xf]  ;;  %v4078_v51 = vld [vmem:[#allocation2 + $0x574] sm:$0xf0]  ;;  %v2954_v52 = vor.u32 %v3982_v44, %v2953_v41  ;;  %v2958_v53 = vor.u32 %v3976_v45, %v2955_v46 }
  0x33   :  { %1308 = vmatpush.bf16.msra.mxu0 %v2706_v16  ;;  %v2905_v54 = vld [vmem:[#allocation2 + $0x1e8] sm:$0xf]  ;;  %v3970_v55 = vld [vmem:[#allocation2 + $0x214] sm:$0xf0]  ;;  %v3342_v56 = vor.u32 %v4072_v48, %v3339_v49  ;;  %v3964_v57 = vld [vmem:[#allocation2 + $0x1ec] sm:$0xf]  ;;  %v3338_v60 = vor.u32 %v4078_v51, %v3337_v50 }
  0x34   :  { %1334 = vmatpush.bf16.msra.mxu2 %v2710_v19  ;;  %v2907_v58 = vld [vmem:[#allocation2 + $0x218] sm:$0xf0]  ;;  %v115_v59 = vld [vmem:[%s4606_s0] sm:$0x3]  ;;  %v4060_v61 = vld [vmem:[#allocation2 + $0x4ec] sm:$0xf]  ;;  %v2906_v1 = vor.u32 %v3970_v55, %v2905_v54 }
  0x35   :  { %1347 = vmatpush.bf16.msra.mxu3 %v3094_v20  ;;  %1321 = vmatpush.bf16.msra.mxu1 %v3090_v24  ;;  %v3291_v62 = vld [vmem:[#allocation2 + $0x518] sm:$0xf0]  ;;  %337 = vst [vmem:[#allocation1] ss:$9 sm:$0xff] %v115_v59  ;;  %v3289_v63 = vld [vmem:[#allocation2 + $0x4e8] sm:$0xf]  ;;  %v2910_v2 = vor.u32 %v3964_v57, %v2907_v58 }
  0x36   :  { %v4066_v0 = vld [vmem:[#allocation2 + $0x514] sm:$0xf0]  ;;  %v2857_v3 = vld [vmem:[#allocation2 + $0x188] sm:$0xf]  ;;  %v3294_v4 = vor.u32 %v4060_v61, %v3291_v62  ;;  %v3952_v6 = vld [vmem:[#allocation2 + $0x18c] sm:$0xf] }
  0x37   :  { %1309 = vmatpush.bf16.msra.mxu0 %v2658_v31  ;;  %v3958_v5 = vld [vmem:[#allocation2 + $0x1b4] sm:$0xf0]  ;;  %v2859_v7 = vld [vmem:[#allocation2 + $0x1b8] sm:$0xf0]  ;;  %v3290_v8 = vor.u32 %v4066_v0, %v3289_v63  ;;  %v4048_v9 = vld [vmem:[#allocation2 + $0x48c] sm:$0xf] }
  0x38   :  { %1335 = vmatpush.bf16.msra.mxu2 %v2662_v35  ;;  %v3243_v10 = vld [vmem:[#allocation2 + $0x4b8] sm:$0xf0]  ;;  %v3241_v11 = vld [vmem:[#allocation2 + $0x488] sm:$0xf]  ;;  %v4054_v12 = vld [vmem:[#allocation2 + $0x4b4] sm:$0xf0]  ;;  %v2858_v13 = vor.u32 %v3958_v5, %v2857_v3  ;;  %v2862_v14 = vor.u32 %v3952_v6, %v2859_v7 }
  0x39   :  { %1348 = vmatpush.bf16.msra.mxu3 %v3046_v36  ;;  %1322 = vmatpush.bf16.msra.mxu1 %v3042_v43  ;;  %v2809_v15 = vld [vmem:[#allocation2 + $0x128] sm:$0xf]  ;;  %v3946_v16 = vld [vmem:[#allocation2 + $0x154] sm:$0xf0]  ;;  %v3940_v17 = vld [vmem:[#allocation2 + $0x12c] sm:$0xf]  ;;  %v3246_v18 = vor.u32 %v4048_v9, %v3243_v10  ;;  %v3242_v22 = vor.u32 %v4054_v12, %v3241_v11 }
  0x3a   :  { %v2811_v19 = vld [vmem:[#allocation2 + $0x158] sm:$0xf0]  ;;  %v4036_v23 = vld [vmem:[#allocation2 + $0x42c] sm:$0xf]  ;;  %v3193_v25 = vld [vmem:[#allocation2 + $0x428] sm:$0xf]  ;;  %v2810_v27 = vor.u32 %v3946_v16, %v2809_v15 }
  0x3b   :  { %1354 = vmatpush.bf16.msrb.mxu0 %v3002_v39  ;;  %v3195_v24 = vld [vmem:[#allocation2 + $0x458] sm:$0xf0]  ;;  %v4042_v26 = vld [vmem:[#allocation2 + $0x454] sm:$0xf0]  ;;  %v2814_v28 = vor.u32 %v3940_v17, %v2811_v19  ;;  %v2761_v29 = vld [vmem:[#allocation2 + $0xc8] sm:$0xf] }
  0x3c   :  { %1380 = vmatpush.bf16.msrb.mxu2 %v3006_v40  ;;  %v4474_v20 = vld [vmem:[#allocation1] sm:$0xff]  ;;  %v4476_v21 = vld [vmem:[#allocation1 + $0x9] sm:$0xff]  ;;  %v3198_v30 = vor.u32 %v4036_v23, %v3195_v24  ;;  %v3928_v32 = vld [vmem:[#allocation2 + $0xcc] sm:$0xf]  ;;  %v3194_v34 = vor.u32 %v4042_v26, %v3193_v25  ;;  %s4395_s24 = smov [#allocation11]   ;;  %s2643_s0 = sshll.u32 %s4617_s11, 4  ;;  %s2644_s0 = int_to_ptr.hbm [resolvable:$true] %s2643_s0 }
  0x3d   :  { %1393 = vmatpush.bf16.msrb.mxu3 %v3390_v42  ;;  %1367 = vmatpush.bf16.msrb.mxu1 %v3386_v47  ;;  %v3934_v31 = vld [vmem:[#allocation2 + $0xf4] sm:$0xf0]  ;;  %v2763_v33 = vld [vmem:[#allocation2 + $0xf8] sm:$0xf0]  ;;  %v4024_v35 = vld [vmem:[#allocation2 + $0x3cc] sm:$0xf] }
  0x3e   :  { %1336 = vmatmul.bf16.vlgmr.msra.gmra.mxu2 %v4474_v20  ;;  %1349 = vmatmul.bf16.vlgmr.msra.gmra.mxu3 %v4476_v21  ;;  %v3147_v36 = vld [vmem:[#allocation2 + $0x3f8] sm:$0xf0]  ;;  %v3145_v37 = vld [vmem:[#allocation2 + $0x3c8] sm:$0xf]  ;;  %v4030_v38 = vld [vmem:[#allocation2 + $0x3f4] sm:$0xf0]  ;;  %v2762_v39 = vor.u32 %v3934_v31, %v2761_v29  ;;  %v2766_v40 = vor.u32 %v3928_v32, %v2763_v33 }
  0x3f   :  { %1355 = vmatpush.bf16.msrb.mxu0 %v2954_v52  ;;  %1323 = vmatmul.bf16.vlgmr.msra.gmra.mxu1 %v4476_v21  ;;  %v2713_v41 = vld [vmem:[#allocation2 + $0x68] sm:$0xf]  ;;  %v3150_v42 = vor.u32 %v4024_v35, %v3147_v36  ;;  %v3922_v43 = vld [vmem:[#allocation2 + $0x94] sm:$0xf0]  ;;  %v3916_v44 = vld [vmem:[#allocation2 + $0x6c] sm:$0xf]  ;;  %v3146_v46 = vor.u32 %v4030_v38, %v3145_v37 }
  0x40   :  { %1381 = vmatpush.bf16.msrb.mxu2 %v2958_v53  ;;  %1310 = vmatmul.bf16.vlgmr.msra.gmra.mxu0 %v4474_v20  ;;  %v2715_v45 = vld [vmem:[#allocation2 + $0x98] sm:$0xf0]  ;;  %v4012_v47 = vld [vmem:[#allocation2 + $0x36c] sm:$0xf]  ;;  %v3097_v49 = vld [vmem:[#allocation2 + $0x368] sm:$0xf]  ;;  %v2714_v51 = vor.u32 %v3922_v43, %v2713_v41 }
  0x41   :  { %1394 = vmatpush.bf16.msrb.mxu3 %v3342_v56  ;;  %1368 = vmatpush.bf16.msrb.mxu1 %v3338_v60  ;;  %v3099_v48 = vld [vmem:[#allocation2 + $0x398] sm:$0xf0]  ;;  %v4018_v50 = vld [vmem:[#allocation2 + $0x394] sm:$0xf0]  ;;  %v2718_v52 = vor.u32 %v3916_v44, %v2715_v45  ;;  %v2665_v53 = vld [vmem:[#allocation2 + $0x8] sm:$0xf] }
  0x42   :  { %v3910_v54 = vld [vmem:[#allocation2 + $0x34] sm:$0xf0]  ;;  %v3904_v55 = vld [vmem:[#allocation2 + $0xc] sm:$0xf]  ;;  %v3102_v56 = vor.u32 %v4012_v47, %v3099_v48  ;;  %v2667_v57 = vld [vmem:[#allocation2 + $0x38] sm:$0xf0]  ;;  %v3098_v60 = vor.u32 %v4018_v50, %v3097_v49 }
  0x43   :  { %1356 = vmatpush.bf16.msrb.mxu0 %v2906_v1  ;;  %v4000_v58 = vld [vmem:[#allocation2 + $0x30c] sm:$0xf]  ;;  %v3051_v59 = vld [vmem:[#allocation2 + $0x338] sm:$0xf0]  ;;  %v3009_v61 = vld [vmem:[#allocation2 + $0x2b0] sm:$0xf]  ;;  %v2666_v3 = vor.u32 %v3910_v54, %v2665_v53 }
  0x44   :  { %1382 = vmatpush.bf16.msrb.mxu2 %v2910_v2  ;;  %v3995_v62 = vld [vmem:[#allocation2 + $0x2dc] sm:$0xf0]  ;;  %v3989_v63 = vld [vmem:[#allocation2 + $0x2b4] sm:$0xf]  ;;  %v3011_v0 = vld [vmem:[#allocation2 + $0x2e0] sm:$0xf0]  ;;  %v3054_v7 = vor.u32 %v4000_v58, %v3051_v59 }
  0x45   :  { %1395 = vmatpush.bf16.msrb.mxu3 %v3294_v4  ;;  %1369 = vmatpush.bf16.msrb.mxu1 %v3290_v8  ;;  %v4085_v1 = vld [vmem:[#allocation2 + $0x5b4] sm:$0xf]  ;;  %v3395_v2 = vld [vmem:[#allocation2 + $0x5e0] sm:$0xf0]  ;;  %v2670_v4 = vor.u32 %v3904_v55, %v2667_v57  ;;  %v3049_v5 = vld [vmem:[#allocation2 + $0x308] sm:$0xf]  ;;  %v3010_v8 = vor.u32 %v3995_v62, %v3009_v61  ;;  %v3014_v11 = vor.u32 %v3989_v63, %v3011_v0 }
  0x46   :  { %v4006_v6 = vld [vmem:[#allocation2 + $0x334] sm:$0xf0]  ;;  %v3393_v9 = vld [vmem:[#allocation2 + $0x5b0] sm:$0xf]  ;;  %v4091_v10 = vld [vmem:[#allocation2 + $0x5dc] sm:$0xf0]  ;;  %v3398_v12 = vor.u32 %v4085_v1, %v3395_v2 }
  0x47   :  { %1357 = vmatpush.bf16.msrb.mxu0 %v2858_v13  ;;  %v2961_v13 = vld [vmem:[#allocation2 + $0x250] sm:$0xf]  ;;  %v3977_v15 = vld [vmem:[#allocation2 + $0x254] sm:$0xf]  ;;  %v3050_v16 = vor.u32 %v4006_v6, %v3049_v5  ;;  %v2963_v17 = vld [vmem:[#allocation2 + $0x280] sm:$0xf0] }
  0x48   :  { %1383 = vmatpush.bf16.msrb.mxu2 %v2862_v14  ;;  %v3983_v14 = vld [vmem:[#allocation2 + $0x27c] sm:$0xf0]  ;;  %v3347_v19 = vld [vmem:[#allocation2 + $0x580] sm:$0xf0]  ;;  %v3345_v24 = vld [vmem:[#allocation2 + $0x550] sm:$0xf]  ;;  %v2966_v26 = vor.u32 %v3977_v15, %v2963_v17 }
  0x49   :  { %1396 = vmatpush.bf16.msrb.mxu3 %v3246_v18  ;;  %1370 = vmatpush.bf16.msrb.mxu1 %v3242_v22  ;;  %v4073_v18 = vld [vmem:[#allocation2 + $0x554] sm:$0xf]  ;;  %v3394_v22 = vor.u32 %v4091_v10, %v3393_v9  ;;  %v2962_v23 = vor.u32 %v3983_v14, %v2961_v13  ;;  %v4079_v25 = vld [vmem:[#allocation2 + $0x57c] sm:$0xf0]  ;;  %v2915_v31 = vld [vmem:[#allocation2 + $0x220] sm:$0xf0] }
  0x4a   :  { %v3971_v29 = vld [vmem:[#allocation2 + $0x21c] sm:$0xf0]  ;;  %v4061_v32 = vld [vmem:[#allocation2 + $0x4f4] sm:$0xf]  ;;  %v3299_v33 = vld [vmem:[#allocation2 + $0x520] sm:$0xf0] }
  0x4b   :  { %1358 = vmatpush.bf16.msrb.mxu0 %v2810_v27  ;;  %v3350_v27 = vor.u32 %v4073_v18, %v3347_v19  ;;  %v3297_v36 = vld [vmem:[#allocation2 + $0x4f0] sm:$0xf]  ;;  %v4067_v37 = vld [vmem:[#allocation2 + $0x51c] sm:$0xf0]  ;;  %v2867_v43 = vld [vmem:[#allocation2 + $0x1c0] sm:$0xf0] }
  0x4c   :  { %1384 = vmatpush.bf16.msrb.mxu2 %v2814_v28  ;;  %v2913_v28 = vld [vmem:[#allocation2 + $0x1f0] sm:$0xf]  ;;  %v3959_v41 = vld [vmem:[#allocation2 + $0x1bc] sm:$0xf0]  ;;  %v4049_v44 = vld [vmem:[#allocation2 + $0x494] sm:$0xf] }
  0x4d   :  { %1397 = vmatpush.bf16.msrb.mxu3 %v3198_v30  ;;  %1371 = vmatpush.bf16.msrb.mxu1 %v3194_v34  ;;  %v3965_v30 = vld [vmem:[#allocation2 + $0x1f4] sm:$0xf]  ;;  %v3346_v34 = vor.u32 %v4079_v25, %v3345_v24  ;;  %v2914_v35 = vor.u32 %v3971_v29, %v2913_v28  ;;  %v3251_v45 = vld [vmem:[#allocation2 + $0x4c0] sm:$0xf0]  ;;  %v3249_v48 = vld [vmem:[#allocation2 + $0x490] sm:$0xf] }
  0x4e   :  { %v2918_v38 = vor.u32 %v3965_v30, %v2915_v31  ;;  %v4055_v49 = vld [vmem:[#allocation2 + $0x4bc] sm:$0xf0]  ;;  %v3941_v54 = vld [vmem:[#allocation2 + $0x134] sm:$0xf]  ;;  %v2819_v55 = vld [vmem:[#allocation2 + $0x160] sm:$0xf0] }
  0x4f   :  { %1359 = vmatpush.bf16.msrb.mxu0 %v2762_v39  ;;  %v3302_v39 = vor.u32 %v4061_v32, %v3299_v33  ;;  %v3947_v53 = vld [vmem:[#allocation2 + $0x15c] sm:$0xf0]  ;;  %v3203_v57 = vld [vmem:[#allocation2 + $0x460] sm:$0xf0]  ;;  %v3250_v58 = vor.u32 %v4055_v49, %v3249_v48  ;;  %v2822_v62 = vor.u32 %v3941_v54, %v2819_v55  ;;  %v2769_v0 = vld [vmem:[#allocation2 + $0xd0] sm:$0xf] }
  0x50   :  { %1385 = vmatpush.bf16.msrb.mxu2 %v2766_v40  ;;  %v2865_v40 = vld [vmem:[#allocation2 + $0x190] sm:$0xf]  ;;  %v4043_v61 = vld [vmem:[#allocation2 + $0x45c] sm:$0xf0]  ;;  %v3929_v2 = vld [vmem:[#allocation2 + $0xd4] sm:$0xf] }
  0x51   :  { %1398 = vmatpush.bf16.msrb.mxu3 %v3150_v42  ;;  %1372 = vmatpush.bf16.msrb.mxu1 %v3146_v46  ;;  %v3953_v42 = vld [vmem:[#allocation2 + $0x194] sm:$0xf]  ;;  %v3298_v46 = vor.u32 %v4067_v37, %v3297_v36  ;;  %v2866_v47 = vor.u32 %v3959_v41, %v2865_v40  ;;  %v3935_v1 = vld [vmem:[#allocation2 + $0xfc] sm:$0xf0]  ;;  %v3155_v5 = vld [vmem:[#allocation2 + $0x400] sm:$0xf0] }
  0x52   :  { %v2870_v50 = vor.u32 %v3953_v42, %v2867_v43  ;;  %v4031_v9 = vld [vmem:[#allocation2 + $0x3fc] sm:$0xf0]  ;;  %v2721_v10 = vld [vmem:[#allocation2 + $0x70] sm:$0xf]  ;;  %v3917_v14 = vld [vmem:[#allocation2 + $0x74] sm:$0xf] }
  0x53   :  { %1360 = vmatpush.bf16.msrb.mxu0 %v2714_v51  ;;  %v3254_v51 = vor.u32 %v4049_v44, %v3251_v45  ;;  %v3923_v13 = vld [vmem:[#allocation2 + $0x9c] sm:$0xf0]  ;;  %v2723_v15 = vld [vmem:[#allocation2 + $0xa0] sm:$0xf0]  ;;  %v3105_v18 = vld [vmem:[#allocation2 + $0x370] sm:$0xf] }
  0x54   :  { %1386 = vmatpush.bf16.msrb.mxu2 %v2718_v52  ;;  %v2817_v52 = vld [vmem:[#allocation2 + $0x130] sm:$0xf]  ;;  %v3107_v17 = vld [vmem:[#allocation2 + $0x3a0] sm:$0xf0]  ;;  %v3911_v25 = vld [vmem:[#allocation2 + $0x3c] sm:$0xf0] }
  0x55   :  { %1399 = vmatpush.bf16.msrb.mxu3 %v3102_v56  ;;  %1373 = vmatpush.bf16.msrb.mxu1 %v3098_v60  ;;  %v4037_v56 = vld [vmem:[#allocation2 + $0x434] sm:$0xf]  ;;  %v2818_v59 = vor.u32 %v3947_v53, %v2817_v52  ;;  %v3201_v60 = vld [vmem:[#allocation2 + $0x430] sm:$0xf]  ;;  %v2675_v29 = vld [vmem:[#allocation2 + $0x40] sm:$0xf0] }
  0x56   :  { %v3206_v63 = vor.u32 %v4037_v56, %v3203_v57  ;;  %v3202_v6 = vor.u32 %v4043_v61, %v3201_v60  ;;  %v2673_v24 = vld [vmem:[#allocation2 + $0x10] sm:$0xf]  ;;  %v4001_v30 = vld [vmem:[#allocation2 + $0x314] sm:$0xf]  ;;  %v3059_v31 = vld [vmem:[#allocation2 + $0x340] sm:$0xf0] }
  0x57   :  { %1361 = vmatpush.bf16.msrb.mxu0 %v2666_v3  ;;  %v2771_v3 = vld [vmem:[#allocation2 + $0x100] sm:$0xf0]  ;;  %v3017_v32 = vld [vmem:[#allocation2 + $0x2b8] sm:$0xf]  ;;  %v3996_v33 = vld [vmem:[#allocation2 + $0x2e4] sm:$0xf0]  ;;  %v3062_v43 = vor.u32 %v4001_v30, %v3059_v31 }
  0x58   :  { %1387 = vmatpush.bf16.msrb.mxu2 %v2670_v4  ;;  %v4025_v4 = vld [vmem:[#allocation2 + $0x3d4] sm:$0xf]  ;;  %v3019_v36 = vld [vmem:[#allocation2 + $0x2e8] sm:$0xf0]  ;;  %v4086_v37 = vld [vmem:[#allocation2 + $0x5bc] sm:$0xf] }
  0x59   :  { %1400 = vmatpush.bf16.msrb.mxu3 %v3054_v7  ;;  %1374 = vmatpush.bf16.msrb.mxu1 %v3050_v16  ;;  %v2770_v7 = vor.u32 %v3935_v1, %v2769_v0  ;;  %v4013_v16 = vld [vmem:[#allocation2 + $0x374] sm:$0xf]  ;;  %v3057_v40 = vld [vmem:[#allocation2 + $0x310] sm:$0xf]  ;;  %v4007_v41 = vld [vmem:[#allocation2 + $0x33c] sm:$0xf0] }
  0x5a   :  { %1362 = vmatmul.bf16.vlgmr.msrb.gmra.mxu0 %v4474_v20  ;;  %v3110_v28 = vor.u32 %v4013_v16, %v3107_v17  ;;  %v3401_v44 = vld [vmem:[#allocation2 + $0x5b8] sm:$0xf]  ;;  %v4092_v45 = vld [vmem:[#allocation2 + $0x5e4] sm:$0xf0]  ;;  %v3058_v49 = vor.u32 %v4007_v41, %v3057_v40  ;;  %v3978_v52 = vld [vmem:[#allocation2 + $0x25c] sm:$0xf] }
  0x5b   :  { %1406 = vmatpush.bf16.msra.mxu0 %v3010_v8  ;;  %1388 = vmatmul.bf16.vlgmr.msrb.gmra.mxu2 %v4474_v20  ;;  %v3153_v8 = vld [vmem:[#allocation2 + $0x3d0] sm:$0xf]  ;;  %v3402_v53 = vor.u32 %v4092_v45, %v3401_v44  ;;  %v2971_v54 = vld [vmem:[#allocation2 + $0x288] sm:$0xf0]  ;;  %v4074_v55 = vld [vmem:[#allocation2 + $0x55c] sm:$0xf] }
  0x5c   :  { %1432 = vmatpush.bf16.msra.mxu2 %v3014_v11  ;;  %1401 = vmatmul.bf16.vlgmr.msrb.gmra.mxu3 %v4476_v21  ;;  %v2774_v11 = vor.u32 %v3929_v2, %v2771_v3  ;;  %v3154_v19 = vor.u32 %v4031_v9, %v3153_v8  ;;  %v3355_v56 = vld [vmem:[#allocation2 + $0x588] sm:$0xf0]  ;;  %v3353_v57 = vld [vmem:[#allocation2 + $0x558] sm:$0xf]  ;;  %v2974_v60 = vor.u32 %v3978_v52, %v2971_v54  ;;  %v3966_v0 = vld [vmem:[#allocation2 + $0x1fc] sm:$0xf] }
  0x5d   :  { %1445 = vmatpush.bf16.msra.mxu3 %v3398_v12  ;;  %1419 = vmatpush.bf16.msra.mxu1 %v3394_v22  ;;  %v3158_v12 = vor.u32 %v4025_v4, %v3155_v5  ;;  %v4019_v22 = vld [vmem:[#allocation2 + $0x39c] sm:$0xf0]  ;;  %v3358_v61 = vor.u32 %v4074_v55, %v3355_v56  ;;  %v2923_v2 = vld [vmem:[#allocation2 + $0x228] sm:$0xf0]  ;;  %v4062_v3 = vld [vmem:[#allocation2 + $0x4fc] sm:$0xf] }
  0x5e   :  { %1375 = vmatmul.bf16.vlgmr.msrb.gmra.mxu1 %v4476_v21  ;;  %v3307_v4 = vld [vmem:[#allocation2 + $0x528] sm:$0xf0]  ;;  %v3305_v5 = vld [vmem:[#allocation2 + $0x4f8] sm:$0xf]  ;;  %v2926_v8 = vor.u32 %v3966_v0, %v2923_v2  ;;  %v4026_v41 = vld [vmem:[#allocation2 + $0x3dc] sm:$0xf] }
  0x5f   :  { %1407 = vmatpush.bf16.msra.mxu0 %v2962_v23  ;;  %v2722_v23 = vor.u32 %v3923_v13, %v2721_v10  ;;  %v3310_v9 = vor.u32 %v4062_v3, %v3307_v4  ;;  %v2873_v10 = vld [vmem:[#allocation2 + $0x198] sm:$0xf]  ;;  %v3259_v16 = vld [vmem:[#allocation2 + $0x4c8] sm:$0xf0]  ;;  %v4032_v44 = vld [vmem:[#allocation2 + $0x404] sm:$0xf0] }
  0x60   :  { %1433 = vmatpush.bf16.msra.mxu2 %v2966_v26  ;;  %v3905_v26 = vld [vmem:[#allocation2 + $0x14] sm:$0xf]  ;;  %v3257_v17 = vld [vmem:[#allocation2 + $0x498] sm:$0xf]  ;;  %v3211_v30 = vld [vmem:[#allocation2 + $0x468] sm:$0xf0] }
  0x61   :  { %1446 = vmatpush.bf16.msra.mxu3 %v3350_v27  ;;  %1420 = vmatpush.bf16.msra.mxu1 %v3346_v34  ;;  %v2726_v27 = vor.u32 %v3917_v14, %v2723_v15  ;;  %v3106_v34 = vor.u32 %v4019_v22, %v3105_v18  ;;  %v2678_v42 = vor.u32 %v3905_v26, %v2675_v29  ;;  %v2875_v14 = vld [vmem:[#allocation2 + $0x1c8] sm:$0xf0]  ;;  %v4050_v15 = vld [vmem:[#allocation2 + $0x49c] sm:$0xf]  ;;  %v4056_v18 = vld [vmem:[#allocation2 + $0x4c4] sm:$0xf0] }
  0x62   :  { %v3942_v26 = vld [vmem:[#allocation2 + $0x13c] sm:$0xf]  ;;  %v3209_v31 = vld [vmem:[#allocation2 + $0x438] sm:$0xf]  ;;  %v2779_v40 = vld [vmem:[#allocation2 + $0x108] sm:$0xf0] }
  0x63   :  { %1408 = vmatpush.bf16.msra.mxu0 %v2914_v35  ;;  %v3990_v35 = vld [vmem:[#allocation2 + $0x2bc] sm:$0xf]  ;;  %v2731_v52 = vld [vmem:[#allocation2 + $0xa8] sm:$0xf0]  ;;  %v3113_v55 = vld [vmem:[#allocation2 + $0x378] sm:$0xf] }
  0x64   :  { %1434 = vmatpush.bf16.msra.mxu2 %v2918_v38  ;;  %v2674_v38 = vor.u32 %v3911_v25, %v2673_v24  ;;  %v2825_v24 = vld [vmem:[#allocation2 + $0x138] sm:$0xf]  ;;  %v3948_v25 = vld [vmem:[#allocation2 + $0x164] sm:$0xf0]  ;;  %v4038_v29 = vld [vmem:[#allocation2 + $0x43c] sm:$0xf] }
  0x65   :  { %1447 = vmatpush.bf16.msra.mxu3 %v3302_v39  ;;  %1421 = vmatpush.bf16.msra.mxu1 %v3298_v46  ;;  %v3403_v39 = vld [vmem:[#allocation2 + $0x5e8] sm:$0xf0]  ;;  %v3018_v46 = vor.u32 %v3996_v33, %v3017_v32  ;;  %v4044_v32 = vld [vmem:[#allocation2 + $0x464] sm:$0xf0]  ;;  %v2826_v33 = vor.u32 %v3948_v25, %v2825_v24  ;;  %v4002_v0 = vld [vmem:[#allocation2 + $0x31c] sm:$0xf] }
  0x66   :  { %v3406_v48 = vor.u32 %v4086_v37, %v3403_v39  ;;  %v3936_v37 = vld [vmem:[#allocation2 + $0x104] sm:$0xf0]  ;;  %v3210_v39 = vor.u32 %v4044_v32, %v3209_v31  ;;  %v3115_v54 = vld [vmem:[#allocation2 + $0x3a8] sm:$0xf0]  ;;  %v3025_v3 = vld [vmem:[#allocation2 + $0x2c0] sm:$0xf] }
  0x67   :  { %1409 = vmatpush.bf16.msra.mxu0 %v2866_v47  ;;  %v3022_v47 = vor.u32 %v3990_v35, %v3019_v36  ;;  %v3214_v35 = vor.u32 %v4038_v29, %v3211_v30  ;;  %v2777_v36 = vld [vmem:[#allocation2 + $0xd8] sm:$0xf]  ;;  %v4020_v56 = vld [vmem:[#allocation2 + $0x3a4] sm:$0xf0]  ;;  %v3067_v2 = vld [vmem:[#allocation2 + $0x348] sm:$0xf0] }
  0x68   :  { %1435 = vmatpush.bf16.msra.mxu2 %v2870_v50  ;;  %v2969_v50 = vld [vmem:[#allocation2 + $0x258] sm:$0xf]  ;;  %v2778_v45 = vor.u32 %v3936_v37, %v2777_v36  ;;  %v3997_v4 = vld [vmem:[#allocation2 + $0x2ec] sm:$0xf0]  ;;  %v3979_v24 = vld [vmem:[#allocation2 + $0x264] sm:$0xf] }
  0x69   :  { %1448 = vmatpush.bf16.msra.mxu3 %v3254_v51  ;;  %1422 = vmatpush.bf16.msra.mxu1 %v3250_v58  ;;  %v3984_v51 = vld [vmem:[#allocation2 + $0x284] sm:$0xf0]  ;;  %v2979_v25 = vld [vmem:[#allocation2 + $0x290] sm:$0xf0]  ;;  %v3361_v29 = vld [vmem:[#allocation2 + $0x560] sm:$0xf] }
  0x6a   :  { %v4080_v58 = vld [vmem:[#allocation2 + $0x584] sm:$0xf0]  ;;  %v4081_v30 = vld [vmem:[#allocation2 + $0x58c] sm:$0xf0]  ;;  %v2982_v32 = vor.u32 %v3979_v24, %v2979_v25  ;;  %v3967_v36 = vld [vmem:[#allocation2 + $0x204] sm:$0xf] }
  0x6b   :  { %1410 = vmatpush.bf16.msra.mxu0 %v2818_v59  ;;  %v2970_v59 = vor.u32 %v3984_v51, %v2969_v50  ;;  %v3354_v1 = vor.u32 %v4080_v58, %v3353_v57  ;;  %v3918_v50 = vld [vmem:[#allocation2 + $0x7c] sm:$0xf]  ;;  %v2681_v58 = vld [vmem:[#allocation2 + $0x18] sm:$0xf]  ;;  %v2931_v37 = vld [vmem:[#allocation2 + $0x230] sm:$0xf0] }
  0x6c   :  { %1436 = vmatpush.bf16.msra.mxu2 %v2822_v62  ;;  %v2921_v62 = vld [vmem:[#allocation2 + $0x1f8] sm:$0xf]  ;;  %v4015_v25 = vld [vmem:[#allocation2 + $0x384] sm:$0xf]  ;;  %s2641_s25 = sshll.u32 %s4395_s24, 4  ;;  %s2642_s25 = int_to_ptr.vmem [resolvable:$true] %s2641_s25 }
  0x6d   :  { %1449 = vmatpush.bf16.msra.mxu3 %v3206_v63  ;;  %1423 = vmatpush.bf16.msra.mxu1 %v3202_v6  ;;  %v3972_v63 = vld [vmem:[#allocation2 + $0x224] sm:$0xf0] }
  0x6e   :  { %v4068_v6 = vld [vmem:[#allocation2 + $0x524] sm:$0xf0] }
  0x6f   :  { %1411 = vmatpush.bf16.msra.mxu0 %v2770_v7  ;;  %v2922_v7 = vor.u32 %v3972_v63, %v2921_v62  ;;  %v3306_v13 = vor.u32 %v4068_v6, %v3305_v5  ;;  %v3906_v62 = vld [vmem:[#allocation2 + $0x1c] sm:$0xf]  ;;  %v2683_v63 = vld [vmem:[#allocation2 + $0x48] sm:$0xf0]  ;;  %v3991_v5 = vld [vmem:[#allocation2 + $0x2c4] sm:$0xf] }
  0x70   :  { %1437 = vmatpush.bf16.msra.mxu2 %v2774_v11  ;;  %v3960_v11 = vld [vmem:[#allocation2 + $0x1c4] sm:$0xf0]  ;;  %v3027_v6 = vld [vmem:[#allocation2 + $0x2f0] sm:$0xf0] }
  0x71   :  { %1450 = vmatpush.bf16.msra.mxu3 %v3158_v12  ;;  %1424 = vmatpush.bf16.msra.mxu1 %v3154_v19  ;;  %v3954_v12 = vld [vmem:[#allocation2 + $0x19c] sm:$0xf]  ;;  %v2874_v19 = vor.u32 %v3960_v11, %v2873_v10  ;;  %v3065_v10 = vld [vmem:[#allocation2 + $0x318] sm:$0xf]  ;;  %v4008_v11 = vld [vmem:[#allocation2 + $0x344] sm:$0xf0] }
  0x72   :  { %v2878_v22 = vor.u32 %v3954_v12, %v2875_v14  ;;  %v2686_v12 = vor.u32 %v3906_v62, %v2683_v63  ;;  %v3409_v14 = vld [vmem:[#allocation2 + $0x5c0] sm:$0xf]  ;;  %v4039_v63 = vld [vmem:[#allocation2 + $0x444] sm:$0xf] }
  0x73   :  { %1412 = vmatpush.bf16.msra.mxu0 %v2722_v23  ;;  %v3262_v23 = vor.u32 %v4050_v15, %v3259_v16  ;;  %v4093_v15 = vld [vmem:[#allocation2 + $0x5ec] sm:$0xf0]  ;;  %v3026_v16 = vor.u32 %v3997_v4, %v3025_v3 }
  0x74   :  { %1438 = vmatpush.bf16.msra.mxu2 %v2726_v27  ;;  %v3258_v27 = vor.u32 %v4056_v18, %v3257_v17  ;;  %v3030_v17 = vor.u32 %v3991_v5, %v3027_v6  ;;  %v2977_v18 = vld [vmem:[#allocation2 + $0x260] sm:$0xf] }
  0x75   :  { %1451 = vmatpush.bf16.msra.mxu3 %v3110_v28  ;;  %1425 = vmatpush.bf16.msra.mxu1 %v3106_v34  ;;  %v2827_v28 = vld [vmem:[#allocation2 + $0x168] sm:$0xf0]  ;;  %v2785_v5 = vld [vmem:[#allocation2 + $0xe0] sm:$0xf] }
  0x76   :  { %v2830_v34 = vor.u32 %v3942_v26, %v2827_v28  ;;  %v3410_v26 = vor.u32 %v4093_v15, %v3409_v14  ;;  %v3363_v28 = vld [vmem:[#allocation2 + $0x590] sm:$0xf0]  ;;  %v4033_v14 = vld [vmem:[#allocation2 + $0x40c] sm:$0xf0] }
  0x77   :  { %1413 = vmatpush.bf16.msra.mxu0 %v2674_v38  ;;  %v3930_v38 = vld [vmem:[#allocation2 + $0xdc] sm:$0xf] }
  0x78   :  { %1439 = vmatpush.bf16.msra.mxu2 %v2678_v42  ;;  %v3163_v42 = vld [vmem:[#allocation2 + $0x408] sm:$0xf0] }
  0x79   :  { %1452 = vmatpush.bf16.msra.mxu3 %v3062_v43  ;;  %1426 = vmatpush.bf16.msra.mxu1 %v3058_v49  ;;  %v3161_v43 = vld [vmem:[#allocation2 + $0x3d8] sm:$0xf]  ;;  %v3924_v49 = vld [vmem:[#allocation2 + $0xa4] sm:$0xf0] }
  0x7a   :  { %1414 = vmatmul.bf16.vlgmr.msra.gmra.mxu0 %v4474_v20  ;;  %v3162_v51 = vor.u32 %v4032_v44, %v3161_v43  ;;  %v2934_v44 = vor.u32 %v3967_v36, %v2931_v37  ;;  %v4003_v36 = vld [vmem:[#allocation2 + $0x324] sm:$0xf]  ;;  %v3075_v37 = vld [vmem:[#allocation2 + $0x350] sm:$0xf0] }
  0x7b   :  { %1458 = vmatpush.bf16.msrb.mxu0 %v3018_v46  ;;  %1440 = vmatmul.bf16.vlgmr.msra.gmra.mxu2 %v4474_v20  ;;  %v2782_v46 = vor.u32 %v3930_v38, %v2779_v40  ;;  %v3362_v38 = vor.u32 %v4081_v30, %v3361_v29  ;;  %v3315_v40 = vld [vmem:[#allocation2 + $0x530] sm:$0xf0] }
  0x7c   :  { %1484 = vmatpush.bf16.msrb.mxu2 %v3022_v47  ;;  %1453 = vmatmul.bf16.vlgmr.msra.gmra.mxu3 %v4476_v21  ;;  %v3166_v47 = vor.u32 %v4026_v41, %v3163_v42  ;;  %v3313_v41 = vld [vmem:[#allocation2 + $0x500] sm:$0xf]  ;;  %v4069_v42 = vld [vmem:[#allocation2 + $0x52c] sm:$0xf0] }
  0x7d   :  { %1497 = vmatpush.bf16.msrb.mxu3 %v3406_v48  ;;  %1471 = vmatpush.bf16.msrb.mxu1 %v3402_v53  ;;  %v2729_v48 = vld [vmem:[#allocation2 + $0x78] sm:$0xf]  ;;  %v4014_v53 = vld [vmem:[#allocation2 + $0x37c] sm:$0xf] }
  0x7e   :  { %1427 = vmatmul.bf16.vlgmr.msra.gmra.mxu1 %v4476_v21  ;;  %v2730_v57 = vor.u32 %v3924_v49, %v2729_v48  ;;  %v3955_v48 = vld [vmem:[#allocation2 + $0x1a4] sm:$0xf]  ;;  %v2883_v49 = vld [vmem:[#allocation2 + $0x1d0] sm:$0xf0] }
  0x7f   :  { %1459 = vmatpush.bf16.msrb.mxu0 %v2970_v59  ;;  %v3912_v59 = vld [vmem:[#allocation2 + $0x44] sm:$0xf0] }
  0x80   :  { %1485 = vmatpush.bf16.msrb.mxu2 %v2974_v60  ;;  %v2734_v60 = vor.u32 %v3918_v50, %v2731_v52  ;;  %v3314_v50 = vor.u32 %v4069_v42, %v3313_v41  ;;  %v3267_v52 = vld [vmem:[#allocation2 + $0x4d0] sm:$0xf0]  ;;  %v3992_v41 = vld [vmem:[#allocation2 + $0x2cc] sm:$0xf]  ;;  %v3035_v42 = vld [vmem:[#allocation2 + $0x2f8] sm:$0xf0] }
  0x81   :  { %1498 = vmatpush.bf16.msrb.mxu3 %v3358_v61  ;;  %1472 = vmatpush.bf16.msrb.mxu1 %v3354_v1  ;;  %v3118_v61 = vor.u32 %v4014_v53, %v3115_v54  ;;  %v3114_v1 = vor.u32 %v4020_v56, %v3113_v55  ;;  %v3265_v53 = vld [vmem:[#allocation2 + $0x4a0] sm:$0xf]  ;;  %v4057_v54 = vld [vmem:[#allocation2 + $0x4cc] sm:$0xf0]  ;;  %v2886_v56 = vor.u32 %v3955_v48, %v2883_v49 }
  0x82   :  { %v3266_v62 = vor.u32 %v4057_v54, %v3265_v53  ;;  %v4009_v48 = vld [vmem:[#allocation2 + $0x34c] sm:$0xf0]  ;;  %v3078_v49 = vor.u32 %v4003_v36, %v3075_v37  ;;  %v3038_v53 = vor.u32 %v3992_v41, %v3035_v42 }
  0x83   :  { %1460 = vmatpush.bf16.msrb.mxu0 %v2922_v7  ;;  %v4087_v7 = vld [vmem:[#allocation2 + $0x5c4] sm:$0xf] }
  0x84   :  { %1486 = vmatpush.bf16.msrb.mxu2 %v2926_v8  ;;  %v2682_v8 = vor.u32 %v3912_v59, %v2681_v58  ;;  %v3949_v59 = vld [vmem:[#allocation2 + $0x16c] sm:$0xf0] }
  0x85   :  { %1499 = vmatpush.bf16.msrb.mxu3 %v3310_v9  ;;  %1473 = vmatpush.bf16.msrb.mxu1 %v3306_v13  ;;  %v3411_v9 = vld [vmem:[#allocation2 + $0x5f0] sm:$0xf0]  ;;  %v3070_v13 = vor.u32 %v4002_v0, %v3067_v2  ;;  %v4045_v2 = vld [vmem:[#allocation2 + $0x46c] sm:$0xf0] }
  0x86   :  { %v3219_v0 = vld [vmem:[#allocation2 + $0x470] sm:$0xf0] }
  0x87   :  { %1461 = vmatpush.bf16.msrb.mxu0 %v2874_v19  ;;  %v3414_v19 = vor.u32 %v4087_v7, %v3411_v9  ;;  %v3222_v6 = vor.u32 %v4039_v63, %v3219_v0  ;;  %v3937_v7 = vld [vmem:[#allocation2 + $0x10c] sm:$0xf0]  ;;  %v2787_v9 = vld [vmem:[#allocation2 + $0x110] sm:$0xf0]  ;;  %v3369_v0 = vld [vmem:[#allocation2 + $0x568] sm:$0xf] }
  0x88   :  { %1487 = vmatpush.bf16.msrb.mxu2 %v2878_v22  ;;  %v3066_v22 = vor.u32 %v4008_v11, %v3065_v10  ;;  %v4027_v11 = vld [vmem:[#allocation2 + $0x3e4] sm:$0xf]  ;;  %v2786_v15 = vor.u32 %v3937_v7, %v2785_v5  ;;  %v3974_v5 = vld [vmem:[#allocation2 + $0x234] sm:$0xf0]  ;;  %v2939_v7 = vld [vmem:[#allocation2 + $0x238] sm:$0xf0] }
  0x89   :  { %1500 = vmatpush.bf16.msrb.mxu3 %v3262_v23  ;;  %1474 = vmatpush.bf16.msrb.mxu1 %v3258_v27  ;;  %v3985_v23 = vld [vmem:[#allocation2 + $0x28c] sm:$0xf0]  ;;  %v4075_v27 = vld [vmem:[#allocation2 + $0x564] sm:$0xf] }
  0x8a   :  { %v2978_v31 = vor.u32 %v3985_v23, %v2977_v18  ;;  %v2739_v23 = vld [vmem:[#allocation2 + $0xb0] sm:$0xf0] }
  0x8b   :  { %1462 = vmatpush.bf16.msrb.mxu0 %v2826_v33  ;;  %v2929_v33 = vld [vmem:[#allocation2 + $0x200] sm:$0xf] }
  0x8c   :  { %1488 = vmatpush.bf16.msrb.mxu2 %v2830_v34  ;;  %v3366_v34 = vor.u32 %v4075_v27, %v3363_v28  ;;  %v3121_v27 = vld [vmem:[#allocation2 + $0x380] sm:$0xf]  ;;  %v4021_v28 = vld [vmem:[#allocation2 + $0x3ac] sm:$0xf0] }
  0x8d   :  { %1501 = vmatpush.bf16.msrb.mxu3 %v3214_v35  ;;  %1475 = vmatpush.bf16.msrb.mxu1 %v3210_v39  ;;  %v3973_v35 = vld [vmem:[#allocation2 + $0x22c] sm:$0xf0]  ;;  %v4063_v39 = vld [vmem:[#allocation2 + $0x504] sm:$0xf] }
  0x8e   :  { %v2930_v43 = vor.u32 %v3973_v35, %v2929_v33  ;;  %v3907_v33 = vld [vmem:[#allocation2 + $0x24] sm:$0xf]  ;;  %v2691_v35 = vld [vmem:[#allocation2 + $0x50] sm:$0xf0] }
  0x8f   :  { %1463 = vmatpush.bf16.msrb.mxu0 %v2778_v45  ;;  %v2881_v45 = vld [vmem:[#allocation2 + $0x1a0] sm:$0xf] }
  0x90   :  { %1489 = vmatpush.bf16.msrb.mxu2 %v2782_v46  ;;  %v3318_v46 = vor.u32 %v4063_v39, %v3315_v40  ;;  %v3033_v39 = vld [vmem:[#allocation2 + $0x2c8] sm:$0xf]  ;;  %v3998_v40 = vld [vmem:[#allocation2 + $0x2f4] sm:$0xf0] }
  0x91   :  { %1502 = vmatpush.bf16.msrb.mxu3 %v3166_v47  ;;  %1476 = vmatpush.bf16.msrb.mxu1 %v3162_v51  ;;  %v3961_v47 = vld [vmem:[#allocation2 + $0x1cc] sm:$0xf0]  ;;  %v4051_v51 = vld [vmem:[#allocation2 + $0x4a4] sm:$0xf] }
  0x92   :  { %v2882_v55 = vor.u32 %v3961_v47, %v2881_v45  ;;  %v3270_v58 = vor.u32 %v4051_v51, %v3267_v52  ;;  %v3073_v47 = vld [vmem:[#allocation2 + $0x320] sm:$0xf]  ;;  %v3417_v51 = vld [vmem:[#allocation2 + $0x5c8] sm:$0xf]  ;;  %v4094_v52 = vld [vmem:[#allocation2 + $0x5f4] sm:$0xf0] }
  0x93   :  { %1464 = vmatpush.bf16.msrb.mxu0 %v2730_v57  ;;  %v2833_v57 = vld [vmem:[#allocation2 + $0x140] sm:$0xf] }
  0x94   :  { %1490 = vmatpush.bf16.msrb.mxu2 %v2734_v60  ;;  %v3943_v60 = vld [vmem:[#allocation2 + $0x144] sm:$0xf]  ;;  %v2834_v3 = vor.u32 %v3949_v59, %v2833_v57  ;;  %v3980_v57 = vld [vmem:[#allocation2 + $0x26c] sm:$0xf]  ;;  %v2987_v59 = vld [vmem:[#allocation2 + $0x298] sm:$0xf0] }
  0x95   :  { %1503 = vmatpush.bf16.msrb.mxu3 %v3118_v61  ;;  %1477 = vmatpush.bf16.msrb.mxu1 %v3114_v1  ;;  %v2835_v61 = vld [vmem:[#allocation2 + $0x170] sm:$0xf0]  ;;  %v3217_v1 = vld [vmem:[#allocation2 + $0x440] sm:$0xf] }
  0x96   :  { %v2838_v4 = vor.u32 %v3943_v60, %v2835_v61  ;;  %v3218_v10 = vor.u32 %v4045_v2, %v3217_v1  ;;  %v4076_v60 = vld [vmem:[#allocation2 + $0x56c] sm:$0xf]  ;;  %v3371_v61 = vld [vmem:[#allocation2 + $0x598] sm:$0xf0]  ;;  %v4082_v1 = vld [vmem:[#allocation2 + $0x594] sm:$0xf0]  ;;  %v2990_v2 = vor.u32 %v3980_v57, %v2987_v59 }
  0x97   :  { %1465 = vmatpush.bf16.msrb.mxu0 %v2682_v8  ;;  %v3931_v8 = vld [vmem:[#allocation2 + $0xe4] sm:$0xf]  ;;  %v3926_v57 = vld [vmem:[#allocation2 + $0xb4] sm:$0xf0]  ;;  %v2747_v59 = vld [vmem:[#allocation2 + $0xb8] sm:$0xf0] }
  0x98   :  { %1491 = vmatpush.bf16.msrb.mxu2 %v2686_v12  ;;  %v3171_v12 = vld [vmem:[#allocation2 + $0x410] sm:$0xf0] }
  0x99   :  { %1504 = vmatpush.bf16.msrb.mxu3 %v3070_v13  ;;  %1478 = vmatpush.bf16.msrb.mxu1 %v3066_v22  ;;  %v3169_v13 = vld [vmem:[#allocation2 + $0x3e0] sm:$0xf]  ;;  %v3174_v18 = vor.u32 %v4027_v11, %v3171_v12  ;;  %v3919_v22 = vld [vmem:[#allocation2 + $0x84] sm:$0xf]  ;;  %v3321_v12 = vld [vmem:[#allocation2 + $0x508] sm:$0xf] }
  0x9a   :  { %1466 = vmatmul.bf16.vlgmr.msrb.gmra.mxu0 %v4474_v20  ;;  %v3170_v24 = vor.u32 %v4033_v14, %v3169_v13  ;;  %v2742_v30 = vor.u32 %v3919_v22, %v2739_v23  ;;  %v4070_v13 = vld [vmem:[#allocation2 + $0x534] sm:$0xf0]  ;;  %v3275_v22 = vld [vmem:[#allocation2 + $0x4d8] sm:$0xf0] }
  0x9b   :  { %1510 = vmatpush.bf16.msra.mxu0 %v3026_v16  ;;  %1492 = vmatmul.bf16.vlgmr.msrb.gmra.mxu2 %v4474_v20  ;;  %v2790_v16 = vor.u32 %v3931_v8, %v2787_v9  ;;  %v4064_v8 = vld [vmem:[#allocation2 + $0x50c] sm:$0xf]  ;;  %v3323_v9 = vld [vmem:[#allocation2 + $0x538] sm:$0xf0] }
  0x9c   :  { %1536 = vmatpush.bf16.msra.mxu2 %v3030_v17  ;;  %1505 = vmatmul.bf16.vlgmr.msrb.gmra.mxu3 %v4476_v21  ;;  %v2737_v17 = vld [vmem:[#allocation2 + $0x80] sm:$0xf]  ;;  %v4496_v23 = vld [vmem:[#allocation1] sm:$0xff] }
  0x9d   :  { %1549 = vmatpush.bf16.msra.mxu3 %v3414_v19  ;;  %1523 = vmatpush.bf16.msra.mxu1 %v3410_v26  ;;  %v3925_v19 = vld [vmem:[#allocation2 + $0xac] sm:$0xf0]  ;;  %v3123_v26 = vld [vmem:[#allocation2 + $0x3b0] sm:$0xf0] }
  0x9e   :  { %1479 = vmatmul.bf16.vlgmr.msrb.gmra.mxu1 %v4476_v21  ;;  %v2738_v29 = vor.u32 %v3925_v19, %v2737_v17  ;;  %v3962_v17 = vld [vmem:[#allocation2 + $0x1d4] sm:$0xf0]  ;;  %v2891_v19 = vld [vmem:[#allocation2 + $0x1d8] sm:$0xf0] }
  0x9f   :  { %1511 = vmatpush.bf16.msra.mxu0 %v2978_v31  ;;  %v2689_v31 = vld [vmem:[#allocation2 + $0x20] sm:$0xf] }
  0xa0   :  { %1537 = vmatpush.bf16.msra.mxu2 %v2982_v32  ;;  %v3913_v32 = vld [vmem:[#allocation2 + $0x4c] sm:$0xf0] }
  0xa1   :  { %1550 = vmatpush.bf16.msra.mxu3 %v3366_v34  ;;  %1524 = vmatpush.bf16.msra.mxu1 %v3362_v38  ;;  %v3126_v34 = vor.u32 %v4015_v25, %v3123_v26  ;;  %v3122_v38 = vor.u32 %v4021_v28, %v3121_v27  ;;  %v2690_v45 = vor.u32 %v3913_v32, %v2689_v31  ;;  %v3273_v26 = vld [vmem:[#allocation2 + $0x4a8] sm:$0xf]  ;;  %v4058_v27 = vld [vmem:[#allocation2 + $0x4d4] sm:$0xf0]  ;;  %v3944_v32 = vld [vmem:[#allocation2 + $0x14c] sm:$0xf] }
  0xa2   :  { %v3950_v31 = vld [vmem:[#allocation2 + $0x174] sm:$0xf0]  ;;  %v3274_v36 = vor.u32 %v4058_v27, %v3273_v26 }
  0xa3   :  { %1512 = vmatpush.bf16.msra.mxu0 %v2930_v43  ;;  %v4088_v43 = vld [vmem:[#allocation2 + $0x5cc] sm:$0xf] }
  0xa4   :  { %1538 = vmatpush.bf16.msra.mxu2 %v2934_v44  ;;  %v3419_v44 = vld [vmem:[#allocation2 + $0x5f8] sm:$0xf0] }
  0xa5   :  { %1551 = vmatpush.bf16.msra.mxu3 %v3318_v46  ;;  %1525 = vmatpush.bf16.msra.mxu1 %v3314_v50  ;;  %v2694_v46 = vor.u32 %v3907_v33, %v2691_v35  ;;  %v3034_v50 = vor.u32 %v3998_v40, %v3033_v39  ;;  %v3422_v54 = vor.u32 %v4088_v43, %v3419_v44  ;;  %v2843_v33 = vld [vmem:[#allocation2 + $0x178] sm:$0xf0]  ;;  %v4046_v39 = vld [vmem:[#allocation2 + $0x474] sm:$0xf0]  ;;  %v2793_v40 = vld [vmem:[#allocation2 + $0xe8] sm:$0xf] }
  0xa6   :  { %v3227_v35 = vld [vmem:[#allocation2 + $0x478] sm:$0xf0]  ;;  %v2846_v41 = vor.u32 %v3944_v32, %v2843_v33  ;;  %v3938_v43 = vld [vmem:[#allocation2 + $0x114] sm:$0xf0]  ;;  %v3932_v44 = vld [vmem:[#allocation2 + $0xec] sm:$0xf] }
  0xa7   :  { %1513 = vmatpush.bf16.msra.mxu0 %v2882_v55  ;;  %v2985_v55 = vld [vmem:[#allocation2 + $0x268] sm:$0xf] }
  0xa8   :  { %1539 = vmatpush.bf16.msra.mxu2 %v2886_v56  ;;  %v3986_v56 = vld [vmem:[#allocation2 + $0x294] sm:$0xf0] }
  0xa9   :  { %1552 = vmatpush.bf16.msra.mxu3 %v3270_v58  ;;  %1526 = vmatpush.bf16.msra.mxu1 %v3266_v62  ;;  %v3074_v58 = vor.u32 %v4009_v48, %v3073_v47  ;;  %v3418_v62 = vor.u32 %v4094_v52, %v3417_v51  ;;  %v2986_v63 = vor.u32 %v3986_v56, %v2985_v55  ;;  %v3179_v47 = vld [vmem:[#allocation2 + $0x418] sm:$0xf0]  ;;  %v4502_v48 = vld [vmem:[#allocation5] sm:$0xff]  ;;  %v3177_v52 = vld [vmem:[#allocation2 + $0x3e8] sm:$0xf] }
  0xaa   :  { %v2794_v51 = vor.u32 %v3938_v43, %v2793_v40  ;;  %v2745_v56 = vld [vmem:[#allocation2 + $0x88] sm:$0xf]  ;;  %v314_v32 = vperm.slane %v4502_v48, 2  ;;  %v315_v33 = vperm.slane %v4502_v48, 3 }
  0xab   :  { %1514 = vmatpush.bf16.msra.mxu0 %v2834_v3  ;;  %v3374_v3 = vor.u32 %v4076_v60, %v3371_v61  ;;  %v4016_v60 = vld [vmem:[#allocation2 + $0x38c] sm:$0xf]  ;;  %v3131_v61 = vld [vmem:[#allocation2 + $0x3b8] sm:$0xf0] }
  0xac   :  { %1540 = vmatpush.bf16.msra.mxu2 %v2838_v4  ;;  %v2937_v4 = vld [vmem:[#allocation2 + $0x208] sm:$0xf] }
  0xad   :  { %1553 = vmatpush.bf16.msra.mxu3 %v3222_v6  ;;  %1527 = vmatpush.bf16.msra.mxu1 %v3218_v10  ;;  %v3968_v6 = vld [vmem:[#allocation2 + $0x20c] sm:$0xf]  ;;  %v3370_v10 = vor.u32 %v4082_v1, %v3369_v0  ;;  %v2938_v11 = vor.u32 %v3974_v5, %v2937_v4  ;;  %v2746_v1 = vor.u32 %v3926_v57, %v2745_v56  ;;  %v313_v4 = vperm.slane %v4502_v48, 1  ;;  %v3523_v56 = vld [vmem:[#allocation7 + $0xd0] sm:$0xf0] }
  0xae   :  { %v2942_v14 = vor.u32 %v3968_v6, %v2939_v7  ;;  %v3134_v7 = vor.u32 %v4016_v60, %v3131_v61  ;;  %v3505_v60 = vld [vmem:[#allocation7 + $0xa0] sm:$0xf]  ;;  %v4117_v61 = vld [vmem:[#allocation7 + $0xac] sm:$0xf0] }
  0xaf   :  { %1515 = vmatpush.bf16.msra.mxu0 %v2786_v15  ;;  %v3326_v15 = vor.u32 %v4064_v8, %v3323_v9  ;;  %v2697_v8 = vld [vmem:[#allocation2 + $0x28] sm:$0xf]  ;;  %v3914_v9 = vld [vmem:[#allocation2 + $0x54] sm:$0xf0] }
  0xb0   :  { %1541 = vmatpush.bf16.msra.mxu2 %v2790_v16  ;;  %v2889_v16 = vld [vmem:[#allocation2 + $0x1a8] sm:$0xf] }
  0xb1   :  { %1554 = vmatpush.bf16.msra.mxu3 %v3174_v18  ;;  %1528 = vmatpush.bf16.msra.mxu1 %v3170_v24  ;;  %v3956_v18 = vld [vmem:[#allocation2 + $0x1ac] sm:$0xf]  ;;  %v3322_v24 = vor.u32 %v4070_v13, %v3321_v12  ;;  %v2890_v25 = vor.u32 %v3962_v17, %v2889_v16  ;;  %v2699_v12 = vld [vmem:[#allocation2 + $0x58] sm:$0xf0]  ;;  %v2698_v17 = vor.u32 %v3914_v9, %v2697_v8  ;;  %v4111_v9 = vld [vmem:[#allocation7 + $0x84] sm:$0xf] }
  0xb2   :  { %v2894_v28 = vor.u32 %v3956_v18, %v2891_v19  ;;  %v4004_v13 = vld [vmem:[#allocation2 + $0x32c] sm:$0xf]  ;;  %v3081_v18 = vld [vmem:[#allocation2 + $0x328] sm:$0xf]  ;;  %v4010_v19 = vld [vmem:[#allocation2 + $0x354] sm:$0xf0] }
  0xb3   :  { %1516 = vmatpush.bf16.msra.mxu0 %v2738_v29  ;;  %v4153_v8 = vld [vmem:[#allocation7 + $0x1cc] sm:$0xf0] }
  0xb4   :  { %1542 = vmatpush.bf16.msra.mxu2 %v2742_v30  ;;  %v2841_v30 = vld [vmem:[#allocation2 + $0x148] sm:$0xf] }
  0xb5   :  { %1555 = vmatpush.bf16.msra.mxu3 %v3126_v34  ;;  %1529 = vmatpush.bf16.msra.mxu1 %v3122_v38  ;;  %v4040_v34 = vld [vmem:[#allocation2 + $0x44c] sm:$0xf]  ;;  %v2842_v37 = vor.u32 %v3950_v31, %v2841_v30  ;;  %v3225_v38 = vld [vmem:[#allocation2 + $0x448] sm:$0xf] }
  0xb6   :  { %v3230_v42 = vor.u32 %v4040_v34, %v3227_v35 }
  0xb7   :  { %1517 = vmatpush.bf16.msra.mxu0 %v2690_v45  ;;  %v2795_v45 = vld [vmem:[#allocation2 + $0x118] sm:$0xf0] }
  0xb8   :  { %1543 = vmatpush.bf16.msra.mxu2 %v2694_v46  ;;  %v4028_v46 = vld [vmem:[#allocation2 + $0x3ec] sm:$0xf] }
  0xb9   :  { %1556 = vmatpush.bf16.msra.mxu3 %v3078_v49  ;;  %1530 = vmatpush.bf16.msra.mxu1 %v3074_v58  ;;  %v3226_v49 = vor.u32 %v4046_v39, %v3225_v38  ;;  %v3182_v55 = vor.u32 %v4028_v46, %v3179_v47  ;;  %v3920_v58 = vld [vmem:[#allocation2 + $0x8c] sm:$0xf]  ;;  %v4125_v46 = vld [vmem:[#allocation7 + $0xec] sm:$0xf0] }
  0xba   :  { %1518 = vmatmul.bf16.vlgmr.msra.gmra.mxu0 %v4496_v23  ;;  %v2750_v6 = vor.u32 %v3920_v58, %v2747_v59 }
  0xbb   :  { %1562 = vmatpush.bf16.msrb.mxu0 %v3034_v50  ;;  %1544 = vmatmul.bf16.vlgmr.msra.gmra.mxu2 %v4474_v20  ;;  %v4052_v20 = vld [vmem:[#allocation2 + $0x4ac] sm:$0xf]  ;;  %v312_v50 = vperm.slane %v4502_v48, 0 }
  0xbc   :  { %1588 = vmatpush.bf16.msrb.mxu2 %v3038_v53  ;;  %1557 = vmatmul.bf16.vlgmr.msra.gmra.mxu3 %v4476_v21  ;;  %v4499_v21 = vld [vmem:[#allocation1 + $0x9] sm:$0xff]  ;;  %v3278_v29 = vor.u32 %v4052_v20, %v3275_v22  ;;  %v4034_v53 = vld [vmem:[#allocation2 + $0x414] sm:$0xf0]  ;;  %v1324_v5 = vpop.f32.mrf.mxu1 }
  0xbd   :  { %1601 = vmatpush.bf16.msrb.mxu3 %v3422_v54  ;;  %1575 = vmatpush.bf16.msrb.mxu1 %v3418_v62  ;;  %v2798_v54 = vor.u32 %v3932_v44, %v2795_v45  ;;  %v1311_v62 = vpop.f32.mrf.mxu0  ;;  %v3537_v45 = vld [vmem:[#allocation7 + $0xe0] sm:$0xf] }
  0xbe   :  { %1531 = vmatmul.bf16.vlgmr.msra.gmra.mxu1 %v4499_v21  ;;  %v1312_v0 = vadd.f32 %v1311_v62, %v312_v50  ;;  %v3539_v50 = vld [vmem:[#allocation7 + $0xf0] sm:$0xf0]  ;;  %v4115_v62 = vld [vmem:[#allocation7 + $0xa4] sm:$0xf] }
  0xbf   :  { %1563 = vmatpush.bf16.msrb.mxu0 %v2986_v63  ;;  %v3178_v63 = vor.u32 %v4034_v53, %v3177_v52  ;;  %v4121_v52 = vld [vmem:[#allocation7 + $0xcc] sm:$0xf0] }
  0xc0   :  { %1589 = vmatpush.bf16.msrb.mxu2 %v2990_v2  ;;  %v3129_v2 = vld [vmem:[#allocation2 + $0x388] sm:$0xf] }
  0xc1   :  { %1602 = vmatpush.bf16.msrb.mxu3 %v3374_v3  ;;  %1576 = vmatpush.bf16.msrb.mxu1 %v3370_v10  ;;  %v4022_v3 = vld [vmem:[#allocation2 + $0x3b4] sm:$0xf0]  ;;  %v3908_v10 = vld [vmem:[#allocation2 + $0x2c] sm:$0xf]  ;;  %v1337_v16 = vpop.f32.mrf.mxu2  ;;  %v1350_v22 = vpop.f32.mrf.mxu3 }
  0xc2   :  { %v1338_v20 = vadd.f32 %v1337_v16, %v313_v4  ;;  %v4107_v16 = vld [vmem:[#allocation7 + $0x64] sm:$0xf] }
  0xc3   :  { %1564 = vmatpush.bf16.msrb.mxu0 %v2938_v11  ;;  %v1325_v11 = vadd.f32 %v1324_v5, %v1312_v0  ;;  %v3665_v0 = vld [vmem:[#allocation7 + $0x1e0] sm:$0xf] }
  0xc4   :  { %1590 = vmatpush.bf16.msrb.mxu2 %v2942_v14  ;;  %v3083_v14 = vld [vmem:[#allocation2 + $0x358] sm:$0xf0]  ;;  %v4506_v26 = vadd.f32 %v1350_v22, %v1338_v20  ;;  %v3457_v22 = vld [vmem:[#allocation7 + $0x40] sm:$0xf] }
  0xc5   :  { %1603 = vmatpush.bf16.msrb.mxu3 %v3326_v15  ;;  %1577 = vmatpush.bf16.msrb.mxu1 %v3322_v24  ;;  %v3130_v15 = vor.u32 %v4022_v3, %v3129_v2  ;;  %v2702_v24 = vor.u32 %v3908_v10, %v2699_v12  ;;  %v1313_v27 = vpop.f32.mrf.mxu0  ;;  %v3506_v2 = vor.u32 %v4117_v61, %v3505_v60  ;;  %v3489_v3 = vld [vmem:[#allocation7 + $0x80] sm:$0xf]  ;;  %v3491_v10 = vld [vmem:[#allocation7 + $0x90] sm:$0xf0]  ;;  %v4097_v61 = vld [vmem:[#allocation7 + $0xc] sm:$0xf0] }
  0xc6   :  { %v3459_v27 = vld [vmem:[#allocation7 + $0x50] sm:$0xf0] }
  0xc7   :  { %1565 = vmatpush.bf16.msrb.mxu0 %v2890_v25  ;;  %v3086_v25 = vor.u32 %v4004_v13, %v3083_v14  ;;  %v3494_v13 = vor.u32 %v4111_v9, %v3491_v10  ;;  %v3473_v14 = vld [vmem:[#allocation7 + $0x60] sm:$0xf] }
  0xc8   :  { %1591 = vmatpush.bf16.msrb.mxu2 %v2894_v28  ;;  %v3082_v28 = vor.u32 %v4010_v19, %v3081_v18  ;;  %v316_v18 = vperm.slane %v4502_v48, 4 }
  0xc9   :  { %1604 = vmatpush.bf16.msrb.mxu3 %v3278_v29  ;;  %1578 = vmatpush.bf16.msrb.mxu1 %v3274_v36  ;;  %v1326_v29 = vpop.f32.mrf.mxu1  ;;  %v1339_v30 = vpop.f32.mrf.mxu2 }
  0xca   :  { %v1352_v31 = vpop.f32.mrf.mxu3 }
  0xcb   :  { %1566 = vmatpush.bf16.msrb.mxu0 %v2842_v37 }
  0xcc   :  { %1592 = vmatpush.bf16.msrb.mxu2 %v2846_v41  ;;  %v1614_v41 = vmax.f32 %v1325_v11, 0.0 }
  0xcd   :  { %1605 = vmatpush.bf16.msrb.mxu3 %v3230_v42  ;;  %1579 = vmatpush.bf16.msrb.mxu1 %v3226_v49  ;;  %v3538_v49 = vor.u32 %v4125_v46, %v3537_v45  ;;  %v3441_v46 = vld [vmem:[#allocation7 + $0x20] sm:$0xf] }
  0xcf   :  { %1567 = vmatpush.bf16.msrb.mxu0 %v2794_v51  ;;  %v3521_v51 = vld [vmem:[#allocation7 + $0xc0] sm:$0xf] }
  0xd0   :  { %1593 = vmatpush.bf16.msrb.mxu2 %v2798_v54  ;;  %v3522_v58 = vor.u32 %v4121_v52, %v3521_v51  ;;  %v4149_v52 = vld [vmem:[#allocation7 + $0x1ac] sm:$0xf0] }
  0xd1   :  { %1606 = vmatpush.bf16.msrb.mxu3 %v3182_v55  ;;  %1580 = vmatpush.bf16.msrb.mxu1 %v3178_v63  ;;  %v4119_v55 = vld [vmem:[#allocation7 + $0xc4] sm:$0xf]  ;;  %v3507_v63 = vld [vmem:[#allocation7 + $0xb0] sm:$0xf0] }
  0xd2   :  { %v3526_v59 = vor.u32 %v4119_v55, %v3523_v56  ;;  %v3510_v5 = vor.u32 %v4115_v62, %v3507_v63  ;;  %v3617_v63 = vld [vmem:[#allocation7 + $0x180] sm:$0xf] }
  0xd3   :  { %1568 = vmatpush.bf16.msrb.mxu0 %v2746_v1  ;;  %v4157_v1 = vld [vmem:[#allocation7 + $0x1ec] sm:$0xf0] }
  0xd4   :  { %1594 = vmatpush.bf16.msrb.mxu2 %v2750_v6  ;;  %v3666_v4 = vor.u32 %v4157_v1, %v3665_v0  ;;  %v4113_v6 = vld [vmem:[#allocation7 + $0x8c] sm:$0xf0]  ;;  %v4095_v1 = vld [vmem:[#allocation7 + $0x4] sm:$0xf] }
  0xd5   :  { %1607 = vmatpush.bf16.msrb.mxu3 %v3134_v7  ;;  %1581 = vmatpush.bf16.msrb.mxu1 %v3130_v15  ;;  %v3649_v7 = vld [vmem:[#allocation7 + $0x1c0] sm:$0xf]  ;;  %v3490_v12 = vor.u32 %v4113_v6, %v3489_v3  ;;  %v4109_v15 = vld [vmem:[#allocation7 + $0x6c] sm:$0xf0]  ;;  %v3667_v6 = vld [vmem:[#allocation7 + $0x1f0] sm:$0xf0] }
  0xd6   :  { %v3650_v11 = vor.u32 %v4153_v8, %v3649_v7  ;;  %v3474_v19 = vor.u32 %v4109_v15, %v3473_v14  ;;  %v4145_v0 = vld [vmem:[#allocation7 + $0x18c] sm:$0xf0] }
  0xd7   :  { %1569 = vmatpush.bf16.msrb.mxu0 %v2698_v17  ;;  %v1363_v34 = vpop.f32.mrf.mxu0  ;;  %v3475_v17 = vld [vmem:[#allocation7 + $0x70] sm:$0xf0]  ;;  %v3618_v3 = vor.u32 %v4145_v0, %v3617_v63  ;;  %v4181_v15 = vld [vmem:[#allocation7 + $0x2ac] sm:$0xf0]  ;;  %v4139_v0 = vld [vmem:[#allocation7 + $0x164] sm:$0xf] }
  0xd8   :  { %1595 = vmatpush.bf16.msrb.mxu2 %v2702_v24  ;;  %v1364_v36 = vadd.f32 %v1363_v34, %v314_v32  ;;  %v3478_v20 = vor.u32 %v4107_v16, %v3475_v17  ;;  %v4105_v24 = vld [vmem:[#allocation7 + $0x4c] sm:$0xf0]  ;;  %v317_v34 = vperm.slane %v4502_v48, 5  ;;  %v3601_v16 = vld [vmem:[#allocation7 + $0x160] sm:$0xf] }
  0xd9   :  { %1608 = vmatpush.bf16.msrb.mxu3 %v3086_v25  ;;  %1582 = vmatpush.bf16.msrb.mxu1 %v3082_v28  ;;  %v4103_v25 = vld [vmem:[#allocation7 + $0x44] sm:$0xf]  ;;  %v3458_v30 = vor.u32 %v4105_v24, %v3457_v22  ;;  %v4141_v17 = vld [vmem:[#allocation7 + $0x16c] sm:$0xf0]  ;;  %v3651_v22 = vld [vmem:[#allocation7 + $0x1d0] sm:$0xf0] }
  0xda   :  { %1570 = vmatmul.bf16.vlgmr.msrb.gmra.mxu0 %v4496_v23  ;;  %v3462_v32 = vor.u32 %v4103_v25, %v3459_v27  ;;  %v3657_v24 = vld [vmem:[#allocation7 + $0x1c8] sm:$0xf]  ;;  %v4154_v27 = vld [vmem:[#allocation7 + $0x1d4] sm:$0xf0] }
  0xdb   :  { %1596 = vmatmul.bf16.vlgmr.msrb.gmra.mxu2 %v4496_v23  ;;  %v1376_v35 = vpop.f32.mrf.mxu1  ;;  %2224 = vmatpush.bf16.msra.mxu0 %v3538_v49  ;;  %v3633_v49 = vld [vmem:[#allocation7 + $0x1a0] sm:$0xf] }
  0xdc   :  { %1609 = vmatmul.bf16.vlgmr.msrb.gmra.mxu3 %v4499_v21  ;;  %1583 = vmatmul.bf16.vlgmr.msrb.gmra.mxu1 %v4499_v21  ;;  %v4514_v40 = vadd.f32 %v1376_v35, %v1364_v36  ;;  %v4123_v21 = vld [vmem:[#allocation7 + $0xe4] sm:$0xf]  ;;  %v1615_v35 = vmax.f32 %v4506_v26, 0.0  ;;  %v3634_v55 = vor.u32 %v4149_v52, %v3633_v49  ;;  %v4133_v49 = vld [vmem:[#allocation7 + $0x12c] sm:$0xf0] }
  0xdd   :  { %v3542_v54 = vor.u32 %v4123_v21, %v3539_v50  ;;  %2237 = vmatpush.bf16.msra.mxu1 %v3666_v4  ;;  %v4101_v21 = vld [vmem:[#allocation7 + $0x2c] sm:$0xf0]  ;;  %v3427_v4 = vld [vmem:[#allocation7 + $0x10] sm:$0xf0]  ;;  %v3625_v52 = vld [vmem:[#allocation7 + $0x188] sm:$0xf] }
  0xde   :  { %v1389_v37 = vpop.f32.mrf.mxu2  ;;  %v3442_v51 = vor.u32 %v4101_v21, %v3441_v46  ;;  %v3430_v9 = vor.u32 %v4095_v1, %v3427_v4  ;;  %v3569_v21 = vld [vmem:[#allocation7 + $0x120] sm:$0xf]  ;;  %v3603_v1 = vld [vmem:[#allocation7 + $0x170] sm:$0xf0] }
  0xdf   :  { %v1390_v38 = vadd.f32 %v1389_v37, %v315_v33  ;;  %v1402_v39 = vpop.f32.mrf.mxu3  ;;  %v1365_v43 = vpop.f32.mrf.mxu0  ;;  %2263 = vmatpush.bf16.msra.mxu3 %v3542_v54  ;;  %2225 = vmatpush.bf16.msra.mxu0 %v3522_v58  ;;  %v3793_v37 = vld [vmem:[#allocation7 + $0x2e0] sm:$0xf]  ;;  %v3443_v54 = vld [vmem:[#allocation7 + $0x30] sm:$0xf0]  ;;  %v4185_v58 = vld [vmem:[#allocation7 + $0x2cc] sm:$0xf0]  ;;  %v3606_v4 = vor.u32 %v4139_v0, %v3603_v1 }
  0xe0   :  { %v1616_v43 = vmax.f32 %v4514_v40, 0.0  ;;  %v3425_v40 = vld [vmem:[#allocation7] sm:$0xf]  ;;  %v318_v0 = vperm.slane %v4502_v48, 6 }
  0xe1   :  { %v1403_v42 = vadd.f32 %v1402_v39, %v1390_v38  ;;  %2238 = vmatpush.bf16.msra.mxu1 %v3650_v11  ;;  %v4189_v38 = vld [vmem:[#allocation7 + $0x2ec] sm:$0xf0]  ;;  %v3426_v62 = vor.u32 %v4097_v61, %v3425_v40  ;;  %v3673_v11 = vld [vmem:[#allocation7 + $0x1e8] sm:$0xf]  ;;  %v3553_v40 = vld [vmem:[#allocation7 + $0x100] sm:$0xf] }
  0xe2   :  { %v3794_v39 = vor.u32 %v4189_v38, %v3793_v37  ;;  %v3635_v37 = vld [vmem:[#allocation7 + $0x1b0] sm:$0xf0]  ;;  %v3641_v38 = vld [vmem:[#allocation7 + $0x1a8] sm:$0xf]  ;;  %v4129_v61 = vld [vmem:[#allocation7 + $0x10c] sm:$0xf0] }
  0xe3   :  { %v1617_v23 = vmax.f32 %v1403_v42, 0.0  ;;  %v1378_v44 = vpop.f32.mrf.mxu1  ;;  %2264 = vmatpush.bf16.msra.mxu3 %v3526_v59  ;;  %2226 = vmatpush.bf16.msra.mxu0 %v3506_v2  ;;  %v3554_v63 = vor.u32 %v4129_v61, %v3553_v40  ;;  %v4118_v40 = vld [vmem:[#allocation7 + $0xb4] sm:$0xf0] }
  0xe4   :  { %2250 = vmatpush.bf16.msra.mxu2 %v3794_v39 }
  0xe5   :  { %v4516_v47 = vmax.f32 %v1614_v41, %v1617_v23  ;;  %2239 = vmatpush.bf16.msra.mxu1 %v3634_v55  ;;  %v4146_v55 = vld [vmem:[#allocation7 + $0x194] sm:$0xf0] }
  0xe6   :  { %v1391_v53 = vpop.f32.mrf.mxu2 }
  0xe7   :  { %v1404_v57 = vpop.f32.mrf.mxu3  ;;  %2265 = vmatpush.bf16.msra.mxu3 %v3510_v5  ;;  %2227 = vmatpush.bf16.msra.mxu0 %v3490_v12  ;;  %v4099_v53 = vld [vmem:[#allocation7 + $0x24] sm:$0xf]  ;;  %v4158_v12 = vld [vmem:[#allocation7 + $0x1f4] sm:$0xf0] }
  0xe8   :  { %v3446_v56 = vor.u32 %v4099_v53, %v3443_v54  ;;  %v3777_v57 = vld [vmem:[#allocation7 + $0x2c0] sm:$0xf]  ;;  %v4155_v5 = vld [vmem:[#allocation7 + $0x1e4] sm:$0xf]  ;;  %v3674_v14 = vor.u32 %v4158_v12, %v3673_v11  ;;  %v4165_v12 = vld [vmem:[#allocation7 + $0x22c] sm:$0xf0] }
  0xe9   :  { %v3778_v60 = vor.u32 %v4185_v58, %v3777_v57  ;;  %v3670_v10 = vor.u32 %v4155_v5, %v3667_v6  ;;  %2240 = vmatpush.bf16.msra.mxu1 %v3618_v3  ;;  %v3626_v58 = vor.u32 %v4146_v55, %v3625_v52  ;;  %v4187_v3 = vld [vmem:[#allocation7 + $0x2e4] sm:$0xf]  ;;  %v3795_v5 = vld [vmem:[#allocation7 + $0x2f0] sm:$0xf0]  ;;  %v3609_v6 = vld [vmem:[#allocation7 + $0x168] sm:$0xf] }
  0xea   :  { %v3697_v11 = vld [vmem:[#allocation7 + $0x220] sm:$0xf]  ;;  %v4175_v52 = vld [vmem:[#allocation7 + $0x284] sm:$0xf]  ;;  %v3561_v55 = vld [vmem:[#allocation7 + $0x108] sm:$0xf] }
  0xeb   :  { %2266 = vmatpush.bf16.msra.mxu3 %v3494_v13  ;;  %2228 = vmatpush.bf16.msra.mxu0 %v3474_v19  ;;  %v3761_v13 = vld [vmem:[#allocation7 + $0x2a0] sm:$0xf]  ;;  %v3602_v19 = vor.u32 %v4141_v17, %v3601_v16  ;;  %v4183_v16 = vld [vmem:[#allocation7 + $0x2c4] sm:$0xf] }
  0xec   :  { %2251 = vmatpush.bf16.msra.mxu2 %v3778_v60 }
  0xed   :  { %2241 = vmatpush.bf16.msra.mxu1 %v3602_v19  ;;  %v3779_v19 = vld [vmem:[#allocation7 + $0x2d0] sm:$0xf0] }
  0xef   :  { %2267 = vmatpush.bf16.msra.mxu3 %v3478_v20  ;;  %2229 = vmatpush.bf16.msra.mxu0 %v3458_v30  ;;  %v4151_v20 = vld [vmem:[#allocation7 + $0x1c4] sm:$0xf]  ;;  %v3658_v30 = vor.u32 %v4154_v27, %v3657_v24  ;;  %v3782_v24 = vor.u32 %v4183_v16, %v3779_v19  ;;  %v3681_v27 = vld [vmem:[#allocation7 + $0x200] sm:$0xf] }
  0xf0   :  { %v3654_v25 = vor.u32 %v4151_v20, %v3651_v22  ;;  %v3593_v20 = vld [vmem:[#allocation7 + $0x148] sm:$0xf] }
  0xf3   :  { %2268 = vmatpush.bf16.msra.mxu3 %v3462_v32  ;;  %2230 = vmatpush.bf16.msra.mxu0 %v3442_v51  ;;  %v3585_v32 = vld [vmem:[#allocation7 + $0x140] sm:$0xf]  ;;  %v3619_v51 = vld [vmem:[#allocation7 + $0x190] sm:$0xf0] }
  0xf7   :  { %v1415_v28 = vpop.f32.mrf.mxu0  ;;  %2269 = vmatpush.bf16.msra.mxu3 %v3446_v56  ;;  %2231 = vmatpush.bf16.msra.mxu0 %v3426_v62  ;;  %v3713_v56 = vld [vmem:[#allocation7 + $0x240] sm:$0xf] }
  0xf8   :  { %v1416_v29 = vadd.f32 %v1415_v28, %v316_v18  ;;  %v3762_v18 = vor.u32 %v4181_v15, %v3761_v13  ;;  %v3745_v28 = vld [vmem:[#allocation7 + $0x280] sm:$0xf]  ;;  %v3698_v13 = vor.u32 %v4165_v12, %v3697_v11  ;;  %v3587_v15 = vld [vmem:[#allocation7 + $0x150] sm:$0xf0]  ;;  %v3481_v11 = vld [vmem:[#allocation7 + $0x68] sm:$0xf] }
  0xf9   :  { %v4110_v12 = vld [vmem:[#allocation7 + $0x74] sm:$0xf0] }
  0xfa   :  { %2252 = vmatpush.bf16.msra.mxu2 %v3762_v18 }
  0xfb   :  { %v1428_v31 = vpop.f32.mrf.mxu1  ;;  %2270 = vmatpush.bf16.msra.mxu3 %v3430_v9  ;;  %2276 = vmatpush.bf16.msrb.mxu0 %v3670_v10  ;;  %v3798_v9 = vor.u32 %v4187_v3, %v3795_v5  ;;  %v3497_v3 = vld [vmem:[#allocation7 + $0x88] sm:$0xf] }
  0xfc   :  { %v1429_v33 = vadd.f32 %v1428_v31, %v1416_v29  ;;  %v4177_v29 = vld [vmem:[#allocation7 + $0x28c] sm:$0xf0] }
  0xfd   :  { %v3746_v31 = vor.u32 %v4177_v29, %v3745_v28  ;;  %v4161_v28 = vld [vmem:[#allocation7 + $0x20c] sm:$0xf0] }
  0xfe   :  { %v1618_v36 = vmax.f32 %v1429_v33, 0.0  ;;  %v1441_v42 = vpop.f32.mrf.mxu2  ;;  %v4137_v33 = vld [vmem:[#allocation7 + $0x14c] sm:$0xf0] }
  0xff   :  { %v1454_v23 = vpop.f32.mrf.mxu3  ;;  %v1442_v44 = vadd.f32 %v1441_v42, %v317_v34  ;;  %v1417_v45 = vpop.f32.mrf.mxu0  ;;  %2315 = vmatpush.bf16.msrb.mxu3 %v3674_v14  ;;  %v3586_v34 = vor.u32 %v4137_v33, %v3585_v32  ;;  %2277 = vmatpush.bf16.msrb.mxu0 %v3654_v25  ;;  %v4150_v42 = vld [vmem:[#allocation7 + $0x1b4] sm:$0xf0]  ;;  %v4135_v14 = vld [vmem:[#allocation7 + $0x144] sm:$0xf] }
 0x100   :  { %v4521_v41 = vmax.f32 %v1615_v35, %v1618_v36  ;;  %2253 = vmatpush.bf16.msra.mxu2 %v3746_v31  ;;  %v4147_v36 = vld [vmem:[#allocation7 + $0x1a4] sm:$0xf]  ;;  %v3642_v45 = vor.u32 %v4150_v42, %v3641_v38  ;;  %v3590_v18 = vor.u32 %v4135_v14, %v3587_v15  ;;  %v4138_v25 = vld [vmem:[#allocation7 + $0x154] sm:$0xf0]  ;;  %v3545_v31 = vld [vmem:[#allocation7 + $0xe8] sm:$0xf]  ;;  %v3482_v14 = vor.u32 %v4110_v12, %v3481_v11 }
 0x101   :  { %v1455_v50 = vadd.f32 %v1454_v23, %v1442_v44  ;;  %2242 = vmatpush.bf16.msra.mxu1 %v3586_v34  ;;  %v3638_v39 = vor.u32 %v4147_v36, %v3635_v37  ;;  %v3729_v23 = vld [vmem:[#allocation7 + $0x260] sm:$0xf]  ;;  %v3594_v29 = vor.u32 %v4138_v25, %v3593_v20  ;;  %v4126_v32 = vld [vmem:[#allocation7 + $0xf4] sm:$0xf0]  ;;  %v4131_v33 = vld [vmem:[#allocation7 + $0x124] sm:$0xf] }
 0x102   :  { %v3546_v34 = vor.u32 %v4126_v32, %v3545_v31  ;;  %v3571_v36 = vld [vmem:[#allocation7 + $0x130] sm:$0xf0]  ;;  %v4179_v37 = vld [vmem:[#allocation7 + $0x2a4] sm:$0xf] }
 0x103   :  { %v1430_v26 = vpop.f32.mrf.mxu1  ;;  %v1619_v59 = vmax.f32 %v1455_v50, 0.0  ;;  %2316 = vmatpush.bf16.msrb.mxu3 %v3658_v30  ;;  %2278 = vmatpush.bf16.msrb.mxu0 %v3638_v39  ;;  %v3570_v50 = vor.u32 %v4133_v49, %v3569_v21  ;;  %v3682_v30 = vor.u32 %v4161_v28, %v3681_v27  ;;  %v3763_v38 = vld [vmem:[#allocation7 + $0x2b0] sm:$0xf0]  ;;  %v3574_v39 = vor.u32 %v4131_v33, %v3571_v36  ;;  %v4122_v21 = vld [vmem:[#allocation7 + $0xd4] sm:$0xf0] }
 0x104   :  { %v4143_v26 = vld [vmem:[#allocation7 + $0x184] sm:$0xf]  ;;  %v3766_v42 = vor.u32 %v4179_v37, %v3763_v38  ;;  %v3801_v38 = vld [vmem:[#allocation7 + $0x2e8] sm:$0xf] }
 0x105   :  { %v4524_v2 = vmax.f32 %v1616_v43, %v1619_v59  ;;  %v4173_v43 = vld [vmem:[#allocation7 + $0x26c] sm:$0xf0]  ;;  %v3622_v54 = vor.u32 %v4143_v26, %v3619_v51  ;;  %2243 = vmatpush.bf16.msra.mxu1 %v3570_v50  ;;  %v4127_v49 = vld [vmem:[#allocation7 + $0x104] sm:$0xf]  ;;  %v3555_v50 = vld [vmem:[#allocation7 + $0x110] sm:$0xf0] }
 0x106   :  { %v1443_v7 = vpop.f32.mrf.mxu2  ;;  %v3730_v46 = vor.u32 %v4173_v43, %v3729_v23  ;;  %v4169_v59 = vld [vmem:[#allocation7 + $0x24c] sm:$0xf0]  ;;  %v3577_v23 = vld [vmem:[#allocation7 + $0x128] sm:$0xf]  ;;  %v4134_v43 = vld [vmem:[#allocation7 + $0x134] sm:$0xf0]  ;;  %v3558_v51 = vor.u32 %v4127_v49, %v3555_v50 }
 0x107   :  { %v1456_v8 = vpop.f32.mrf.mxu3  ;;  %2317 = vmatpush.bf16.msrb.mxu3 %v3642_v45  ;;  %2279 = vmatpush.bf16.msrb.mxu0 %v3622_v54  ;;  %v3714_v60 = vor.u32 %v4169_v59, %v3713_v56  ;;  %v4142_v7 = vld [vmem:[#allocation7 + $0x174] sm:$0xf0]  ;;  %v3529_v45 = vld [vmem:[#allocation7 + $0xc8] sm:$0xf]  ;;  %v3747_v54 = vld [vmem:[#allocation7 + $0x290] sm:$0xf0] }
 0x108   :  { %2254 = vmatpush.bf16.msra.mxu2 %v3730_v46  ;;  %v3610_v10 = vor.u32 %v4142_v7, %v3609_v6  ;;  %v3578_v46 = vor.u32 %v4134_v43, %v3577_v23  ;;  %v3530_v26 = vor.u32 %v4122_v21, %v3529_v45  ;;  %v3750_v56 = vor.u32 %v4175_v52, %v3747_v54  ;;  %v4535_v6 = vld [vmem:[#allocation5 + $0x8] sm:$0xf]  ;;  %v4167_v7 = vld [vmem:[#allocation7 + $0x244] sm:$0xf]  ;;  %v4190_v23 = vld [vmem:[#allocation7 + $0x2f4] sm:$0xf0] }
 0x109   :  { %2244 = vmatpush.bf16.msra.mxu1 %v3554_v63  ;;  %v3731_v63 = vld [vmem:[#allocation7 + $0x270] sm:$0xf0]  ;;  %v4188_v43 = vld [vmem:[#allocation7 + $0x2ec] sm:$0xf]  ;;  %v3803_v45 = vld [vmem:[#allocation7 + $0x2f8] sm:$0xf0] }
 0x10a   :  { %v3785_v52 = vld [vmem:[#allocation7 + $0x2c8] sm:$0xf]  ;;  %v322_v11 = vperm.slane %v4535_v6, 2 }
 0x10b   :  { %2318 = vmatpush.bf16.msrb.mxu3 %v3626_v58  ;;  %2280 = vmatpush.bf16.msrb.mxu0 %v3606_v4  ;;  %v4130_v58 = vld [vmem:[#allocation7 + $0x114] sm:$0xf0]  ;;  %v3433_v54 = vld [vmem:[#allocation7 + $0x8] sm:$0xf] }
 0x10c   :  { %2255 = vmatpush.bf16.msra.mxu2 %v3714_v60  ;;  %v3562_v59 = vor.u32 %v4130_v58, %v3561_v55  ;;  %v3513_v60 = vld [vmem:[#allocation7 + $0xa8] sm:$0xf]  ;;  %v4114_v4 = vld [vmem:[#allocation7 + $0x94] sm:$0xf0] }
 0x10d   :  { %2289 = vmatpush.bf16.msrb.mxu1 %v3798_v9  ;;  %v3514_v61 = vor.u32 %v4118_v40, %v3513_v60  ;;  %v3498_v5 = vor.u32 %v4114_v4, %v3497_v3  ;;  %v4098_v55 = vld [vmem:[#allocation7 + $0x14] sm:$0xf0]  ;;  %v3787_v60 = vld [vmem:[#allocation7 + $0x2d8] sm:$0xf0]  ;;  %v319_v3 = vperm.slane %v4502_v48, 7 }
 0x10e   :  { %v4186_v58 = vld [vmem:[#allocation7 + $0x2d4] sm:$0xf0]  ;;  %v3434_v40 = vor.u32 %v4098_v55, %v3433_v54 }
 0x10f   :  { %2319 = vmatpush.bf16.msrb.mxu3 %v3610_v10  ;;  %2281 = vmatpush.bf16.msrb.mxu0 %v3590_v18  ;;  %v3699_v18 = vld [vmem:[#allocation7 + $0x230] sm:$0xf0] }
 0x110   :  { %2256 = vmatpush.bf16.msra.mxu2 %v3698_v13  ;;  %v321_v13 = vperm.slane %v4535_v6, 1 }
 0x111   :  { %2290 = vmatpush.bf16.msrb.mxu1 %v3782_v24  ;;  %v4106_v24 = vld [vmem:[#allocation7 + $0x54] sm:$0xf0] }
 0x113   :  { %2320 = vmatpush.bf16.msrb.mxu3 %v3594_v29  ;;  %2282 = vmatpush.bf16.msrb.mxu0 %v3574_v39  ;;  %v4159_v29 = vld [vmem:[#allocation7 + $0x204] sm:$0xf]  ;;  %v4102_v39 = vld [vmem:[#allocation7 + $0x34] sm:$0xf0] }
 0x114   :  { %2257 = vmatpush.bf16.msra.mxu2 %v3682_v30  ;;  %v3683_v30 = vld [vmem:[#allocation7 + $0x210] sm:$0xf0] }
 0x115   :  { %2291 = vmatpush.bf16.msrb.mxu1 %v3766_v42  ;;  %v3686_v33 = vor.u32 %v4159_v29, %v3683_v30  ;;  %v3721_v30 = vld [vmem:[#allocation7 + $0x248] sm:$0xf] }
 0x117   :  { %v4526_v35 = vpop.f32.mrf.mxu0  ;;  %2321 = vmatpush.bf16.msrb.mxu3 %v3578_v46  ;;  %2283 = vmatpush.bf16.msrb.mxu0 %v3558_v51  ;;  %v3806_v51 = vor.u32 %v4188_v43, %v3803_v45  ;;  %v4124_v43 = vld [vmem:[#allocation7 + $0xec] sm:$0xf]  ;;  %v3547_v45 = vld [vmem:[#allocation7 + $0xf8] sm:$0xf0] }
 0x118   :  { %2302 = vmatpush.bf16.msrb.mxu2 %v3546_v34  ;;  %v1468_v9 = vadd.f32 %v4526_v35, %v318_v0  ;;  %v3465_v35 = vld [vmem:[#allocation7 + $0x48] sm:$0xf]  ;;  %v4180_v0 = vld [vmem:[#allocation7 + $0x2ac] sm:$0xf]  ;;  %v3550_v54 = vor.u32 %v4124_v43, %v3547_v45 }
 0x119   :  { %2292 = vmatpush.bf16.msrb.mxu1 %v3750_v56  ;;  %v3466_v28 = vor.u32 %v4106_v24, %v3465_v35  ;;  %v4132_v45 = vld [vmem:[#allocation7 + $0x12c] sm:$0xf] }
 0x11b   :  { %v4528_v44 = vpop.f32.mrf.mxu1  ;;  %2322 = vmatpush.bf16.msrb.mxu3 %v3562_v59  ;;  %v4184_v59 = vld [vmem:[#allocation7 + $0x2cc] sm:$0xf] }
 0x11c   :  { %2303 = vmatpush.bf16.msrb.mxu2 %v3530_v26  ;;  %v1481_v19 = vadd.f32 %v4528_v44, %v1468_v9  ;;  %v3449_v44 = vld [vmem:[#allocation7 + $0x28] sm:$0xf]  ;;  %v3802_v26 = vor.u32 %v4190_v23, %v3801_v38  ;;  %v4176_v9 = vld [vmem:[#allocation7 + $0x28c] sm:$0xf] }
 0x11d   :  { %v3450_v46 = vor.u32 %v4102_v39, %v3449_v44 }
 0x11e   :  { %v4530_v53 = vpop.f32.mrf.mxu2  ;;  %v1620_v31 = vmax.f32 %v1481_v19, 0.0  ;;  %v4174_v19 = vld [vmem:[#allocation7 + $0x274] sm:$0xf0] }
 0x11f   :  { %v4532_v57 = vpop.f32.mrf.mxu3  ;;  %v1469_v62 = vpop.f32.mrf.mxu0  ;;  %v1494_v12 = vadd.f32 %v4530_v53, %v319_v3  ;;  %v3691_v3 = vld [vmem:[#allocation7 + $0x218] sm:$0xf0] }
 0x120   :  { %v4171_v62 = vld [vmem:[#allocation7 + $0x264] sm:$0xf]  ;;  %2304 = vmatpush.bf16.msrb.mxu2 %v3514_v61  ;;  %v3790_v61 = vor.u32 %v4184_v59, %v3787_v60  ;;  %v4120_v59 = vld [vmem:[#allocation7 + $0xcc] sm:$0xf]  ;;  %v3531_v60 = vld [vmem:[#allocation7 + $0xd8] sm:$0xf0] }
 0x121   :  { %v3734_v1 = vor.u32 %v4171_v62, %v3731_v63  ;;  %v3769_v62 = vld [vmem:[#allocation7 + $0x2a8] sm:$0xf]  ;;  %v4182_v63 = vld [vmem:[#allocation7 + $0x2b4] sm:$0xf0]  ;;  %v1507_v24 = vadd.f32 %v4532_v57, %v1494_v12 }
 0x122   :  { %v3770_v4 = vor.u32 %v4182_v63, %v3769_v62  ;;  %v3689_v62 = vld [vmem:[#allocation7 + $0x208] sm:$0xf]  ;;  %v4162_v63 = vld [vmem:[#allocation7 + $0x214] sm:$0xf0] }
 0x123   :  { %v1482_v8 = vpop.f32.mrf.mxu1  ;;  %2293 = vmatpush.bf16.msrb.mxu1 %v3734_v1  ;;  %v3771_v1 = vld [vmem:[#allocation7 + $0x2b8] sm:$0xf0] }
 0x124   :  { %v3715_v8 = vld [vmem:[#allocation7 + $0x250] sm:$0xf0]  ;;  %2305 = vmatpush.bf16.msrb.mxu2 %v3498_v5  ;;  %v3774_v5 = vor.u32 %v4180_v0, %v3771_v1  ;;  %v4160_v1 = vld [vmem:[#allocation7 + $0x20c] sm:$0xf] }
 0x125   :  { %v3718_v10 = vor.u32 %v4167_v7, %v3715_v8  ;;  %v3753_v7 = vld [vmem:[#allocation7 + $0x288] sm:$0xf]  ;;  %v4178_v8 = vld [vmem:[#allocation7 + $0x294] sm:$0xf0] }
 0x126   :  { %v1495_v17 = vpop.f32.mrf.mxu2 }
 0x127   :  { %v1508_v22 = vpop.f32.mrf.mxu3  ;;  %2294 = vmatpush.bf16.msrb.mxu1 %v3718_v10  ;;  %v4163_v17 = vld [vmem:[#allocation7 + $0x224] sm:$0xf]  ;;  %v3755_v10 = vld [vmem:[#allocation7 + $0x298] sm:$0xf0] }
 0x128   :  { %v3702_v20 = vor.u32 %v4163_v17, %v3699_v18  ;;  %2306 = vmatpush.bf16.msrb.mxu2 %v3482_v14  ;;  %v3754_v14 = vor.u32 %v4178_v8, %v3753_v7  ;;  %v3758_v17 = vor.u32 %v4176_v9, %v3755_v10  ;;  %v3737_v18 = vld [vmem:[#allocation7 + $0x268] sm:$0xf]  ;;  %v3534_v7 = vor.u32 %v4120_v59, %v3531_v60  ;;  %v4116_v9 = vld [vmem:[#allocation7 + $0xac] sm:$0xf]  ;;  %v3515_v10 = vld [vmem:[#allocation7 + $0xb8] sm:$0xf0] }
 0x129   :  { %v3738_v53 = vor.u32 %v4174_v19, %v3737_v18  ;;  %v3659_v18 = vld [vmem:[#allocation7 + $0x1d8] sm:$0xf0]  ;;  %v4112_v19 = vld [vmem:[#allocation7 + $0x8c] sm:$0xf]  ;;  %v4198_v59 = vld [vmem:[%s4611_s5 + $0x38] sm:$0xff] }
 0x12a   :  { %v4197_v60 = vld [vmem:[%s4611_s5 + $0x30] sm:$0xff] }
 0x12b   :  { %2295 = vmatpush.bf16.msrb.mxu1 %v3702_v20  ;;  %v4172_v20 = vld [vmem:[#allocation7 + $0x26c] sm:$0xf] }
 0x12c   :  { %2307 = vmatpush.bf16.msrb.mxu2 %v3466_v28  ;;  %v323_v28 = vperm.slane %v4535_v6, 3 }
 0x12f   :  { %2296 = vmatpush.bf16.msrb.mxu1 %v3686_v33  ;;  %v4168_v33 = vld [vmem:[#allocation7 + $0x24c] sm:$0xf] }
 0x130   :  { %2308 = vmatpush.bf16.msrb.mxu2 %v3450_v46  ;;  %v3705_v46 = vld [vmem:[#allocation7 + $0x228] sm:$0xf] }
 0x134   :  { %2309 = vmatpush.bf16.msrb.mxu2 %v3434_v40 }
 0x137   :  { %v4539_v15 = vpop.f32.mrf.mxu0 }
 0x13b   :  { %v4541_v16 = vpop.f32.mrf.mxu1 }
 0x13e   :  { %v1545_v22 = vpop.f32.mrf.mxu2 }
 0x13f   :  { %v1546_v25 = vadd.f32 %v1545_v22, %v321_v13  ;;  %v1558_v27 = vpop.f32.mrf.mxu3  ;;  %v1521_v36 = vpop.f32.mrf.mxu0  ;;  %v320_v13 = vperm.slane %v4535_v6, 0  ;;  %v3739_v22 = vld [vmem:[#allocation7 + $0x278] sm:$0xf0] }
 0x140   :  { %v3742_v29 = vor.u32 %v4172_v20, %v3739_v22  ;;  %v1621_v36 = vmax.f32 %v1507_v24, 0.0  ;;  %v3499_v20 = vld [vmem:[#allocation7 + $0x98] sm:$0xf0] }
 0x141   :  { %v1559_v32 = vadd.f32 %v1558_v27, %v1546_v25  ;;  %v1520_v25 = vadd.f32 %v4539_v15, %v320_v13  ;;  %v3694_v13 = vor.u32 %v4160_v1, %v3691_v3  ;;  %v3502_v24 = vor.u32 %v4112_v19, %v3499_v20  ;;  %v4193_v1 = vld [vmem:[%s4611_s5 + $0x10] sm:$0xff]  ;;  %v1734_v19 = vld [vmem:[%s4610_s4] sm:$0xf] }
 0x143   :  { %v1623_v34 = vmax.f32 %v1559_v32, 0.0  ;;  %v1534_v37 = vpop.f32.mrf.mxu1  ;;  %v4170_v32 = vld [vmem:[#allocation7 + $0x254] sm:$0xf0]  ;;  %v1533_v38 = vadd.f32 %v4541_v16, %v1520_v25  ;;  %v4108_v25 = vld [vmem:[#allocation7 + $0x6c] sm:$0xf] }
 0x144   :  { %v3722_v15 = vor.u32 %v4170_v32, %v3721_v30  ;;  %v3467_v32 = vld [vmem:[#allocation7 + $0x58] sm:$0xf0] }
 0x145   :  { %v1629_v42 = vmax.f32 %v1620_v31, %v1623_v34  ;;  %v3723_v34 = vld [vmem:[#allocation7 + $0x258] sm:$0xf0] }
 0x146   :  { %v1547_v21 = vpop.f32.mrf.mxu2  ;;  %v3726_v39 = vor.u32 %v4168_v33, %v3723_v34  ;;  %v4140_v34 = vld [vmem:[#allocation7 + $0x16c] sm:$0xf] }
 0x147   :  { %v1632_v49 = vmax.f32 %v4516_v47, %v1629_v42  ;;  %v1560_v50 = vpop.f32.mrf.mxu3  ;;  %v3786_v47 = vor.u32 %v4186_v58, %v3785_v52  ;;  %v4166_v21 = vld [vmem:[#allocation7 + $0x234] sm:$0xf0]  ;;  %v1622_v52 = vmax.f32 %v1533_v38, 0.0  ;;  %v4100_v38 = vld [vmem:[#allocation7 + $0x2c] sm:$0xf] }
 0x148   :  { %v3707_v50 = vld [vmem:[#allocation7 + $0x238] sm:$0xf0]  ;;  %v3706_v40 = vor.u32 %v4166_v21, %v3705_v46 }
 0x149   :  { %v4545_v56 = vpack.c.bf16 %v1632_v49, %v1632_v49  ;;  %v4164_v49 = vld [vmem:[#allocation7 + $0x22c] sm:$0xf]  ;;  %v3579_v46 = vld [vmem:[#allocation7 + $0x138] sm:$0xf0] }
 0x14b   :  { %2232 = vmatmul.bf16.vlgmr.msra.gmra.mxu0 %v4545_v56  ;;  %2271 = vmatmul.bf16.vlgmr.msra.gmra.mxu3 %v4545_v56 }
 0x14c   :  { %2328 = vmatpush.bf16.msra.mxu0 %v3802_v26  ;;  %2367 = vmatpush.bf16.msra.mxu3 %v3806_v51 }
 0x150   :  { %2329 = vmatpush.bf16.msra.mxu0 %v3786_v47  ;;  %2368 = vmatpush.bf16.msra.mxu3 %v3790_v61  ;;  %v3710_v47 = vor.u32 %v4164_v49, %v3707_v50  ;;  %v4156_v61 = vld [vmem:[#allocation7 + $0x1ec] sm:$0xf]  ;;  %v3582_v49 = vor.u32 %v4132_v45, %v3579_v46 }
 0x151   :  { %v4128_v50 = vld [vmem:[#allocation7 + $0x10c] sm:$0xf] }
 0x154   :  { %2330 = vmatpush.bf16.msra.mxu0 %v3770_v4  ;;  %2369 = vmatpush.bf16.msra.mxu3 %v3774_v5 }
 0x157   :  { %v1571_v48 = vpop.f32.mrf.mxu0 }
 0x158   :  { %v1572_v35 = vadd.f32 %v1571_v48, %v322_v11  ;;  %2331 = vmatpush.bf16.msra.mxu0 %v3754_v14  ;;  %2370 = vmatpush.bf16.msra.mxu3 %v3758_v17  ;;  %v3690_v11 = vor.u32 %v4162_v63, %v3689_v62  ;;  %v4152_v17 = vld [vmem:[#allocation7 + $0x1cc] sm:$0xf]  ;;  %v3518_v48 = vor.u32 %v4116_v9, %v3515_v10 }
 0x159   :  { %v1584_v27 = vpop.f32.mrf.mxu1  ;;  %v3662_v22 = vor.u32 %v4152_v17, %v3659_v18  ;;  %v4191_v9 = vld [vmem:[%s4611_s5] sm:$0xff] }
 0x15a   :  { %v1585_v31 = vadd.f32 %v1584_v27, %v1572_v35  ;;  %v3643_v35 = vld [vmem:[#allocation7 + $0x1b8] sm:$0xf0] }
 0x15b   :  { %v3483_v27 = vld [vmem:[#allocation7 + $0x78] sm:$0xf0] }
 0x15c   :  { %v1624_v37 = vmax.f32 %v1585_v31, 0.0  ;;  %2332 = vmatpush.bf16.msra.mxu0 %v3738_v53  ;;  %2371 = vmatpush.bf16.msra.mxu3 %v3742_v29  ;;  %v4144_v53 = vld [vmem:[#allocation7 + $0x18c] sm:$0xf]  ;;  %v3627_v29 = vld [vmem:[#allocation7 + $0x198] sm:$0xf0]  ;;  %v3486_v30 = vor.u32 %v4108_v25, %v3483_v27  ;;  %v1736_v25 = vperm.slane %v1734_v19, 0 }
 0x15d   :  { %v4104_v31 = vld [vmem:[#allocation7 + $0x4c] sm:$0xf]  ;;  %v3630_v33 = vor.u32 %v4144_v53, %v3627_v29  ;;  %v1739_v53 = vperm.slane %v1734_v19, 3  ;;  %v4202_v29 = vld [vmem:[#allocation8 + $0x18] sm:$0xff] }
 0x15e   :  { %v1597_v44 = vpop.f32.mrf.mxu2  ;;  %v1630_v6 = vmax.f32 %v1621_v36, %v1624_v37  ;;  %v3611_v36 = vld [vmem:[#allocation7 + $0x178] sm:$0xf0]  ;;  %v3470_v37 = vor.u32 %v4104_v31, %v3467_v32 }
 0x15f   :  { %v1610_v57 = vpop.f32.mrf.mxu3  ;;  %v1598_v42 = vadd.f32 %v1597_v44, %v323_v28  ;;  %v1573_v23 = vpop.f32.mrf.mxu0  ;;  %v3451_v44 = vld [vmem:[#allocation7 + $0x38] sm:$0xf0] }
 0x160   :  { %v1633_v26 = vmax.f32 %v4521_v41, %v1630_v6  ;;  %2333 = vmatpush.bf16.msra.mxu0 %v3722_v15  ;;  %2372 = vmatpush.bf16.msra.mxu3 %v3726_v39  ;;  %v3675_v41 = vld [vmem:[#allocation7 + $0x1f8] sm:$0xf0]  ;;  %v4136_v15 = vld [vmem:[#allocation7 + $0x14c] sm:$0xf]  ;;  %v3454_v6 = vor.u32 %v4100_v38, %v3451_v44  ;;  %v4201_v38 = vld [vmem:[#allocation8 + $0x10] sm:$0xff] }
 0x161   :  { %v1611_v51 = vadd.f32 %v1610_v57, %v1598_v42  ;;  %v1586_v16 = vpop.f32.mrf.mxu1  ;;  %v3678_v12 = vor.u32 %v4156_v61, %v3675_v41  ;;  %v3614_v57 = vor.u32 %v4140_v34, %v3611_v36  ;;  %v3595_v39 = vld [vmem:[#allocation7 + $0x158] sm:$0xf0]  ;;  %v4096_v42 = vld [vmem:[#allocation7 + $0xc] sm:$0xf] }
 0x162   :  { %v4558_v55 = vpack.c.bf16 %v1633_v26, %v1633_v26  ;;  %v3435_v23 = vld [vmem:[#allocation7 + $0x18] sm:$0xf0]  ;;  %v3598_v43 = vor.u32 %v4136_v15, %v3595_v39 }
 0x163   :  { %v1625_v58 = vmax.f32 %v1611_v51, 0.0  ;;  %v3438_v21 = vor.u32 %v4096_v42, %v3435_v23  ;;  %v3563_v26 = vld [vmem:[#allocation7 + $0x118] sm:$0xf0] }
 0x164   :  { %2245 = vmatmul.bf16.vlgmr.msra.gmra.mxu1 %v4558_v55  ;;  %2284 = vmatmul.bf16.vlgmr.msrb.gmra.mxu0 %v4558_v55  ;;  %v3566_v51 = vor.u32 %v4128_v50, %v3563_v26 }
 0x165   :  { %v1631_v0 = vmax.f32 %v1622_v52, %v1625_v58  ;;  %2323 = vmatmul.bf16.vlgmr.msrb.gmra.mxu3 %v4558_v55  ;;  %2341 = vmatpush.bf16.msra.mxu1 %v3550_v54 }
 0x166   :  { %v1599_v4 = vpop.f32.mrf.mxu2  ;;  %2334 = vmatpush.bf16.msra.mxu0 %v3706_v40  ;;  %2373 = vmatpush.bf16.msra.mxu3 %v3710_v47 }
 0x167   :  { %v1612_v5 = vpop.f32.mrf.mxu3  ;;  %v1634_v8 = vmax.f32 %v4524_v2, %v1631_v0  ;;  %v4148_v2 = vld [vmem:[#allocation7 + $0x1ac] sm:$0xf]  ;;  %v4194_v0 = vld [vmem:[%s4611_s5 + $0x18] sm:$0xff] }
 0x168   :  { %v3646_v28 = vor.u32 %v4148_v2, %v3643_v35  ;;  %v1737_v2 = vperm.slane %v1734_v19, 1  ;;  %v4203_v35 = vld [vmem:[#allocation8 + $0x20] sm:$0xff] }
 0x169   :  { %v1637_v14 = vpack.c.bf16 %v1634_v8, %v1634_v8  ;;  %2342 = vmatpush.bf16.msra.mxu1 %v3534_v7  ;;  %v4192_v7 = vld [vmem:[%s4611_s5 + $0x8] sm:$0xff] }
 0x16a   :  { %2335 = vmatpush.bf16.msra.mxu0 %v3690_v11  ;;  %2374 = vmatpush.bf16.msra.mxu3 %v3694_v13  ;;  %v4206_v13 = vld [vmem:[#allocation8 + $0x38] sm:$0xff] }
 0x16b   :  { %2258 = vmatmul.bf16.vlgmr.msra.gmra.mxu2 %v1637_v14 }
 0x16c   :  { %2354 = vmatpush.bf16.msra.mxu2 %v3678_v12 }
 0x16d   :  { %2343 = vmatpush.bf16.msra.mxu1 %v3518_v48  ;;  %v4204_v48 = vld [vmem:[#allocation8 + $0x28] sm:$0xff] }
 0x16e   :  { %2456 = vmatpush.bf16.msrb.mxu0 %v4198_v59  ;;  %v4211_v59 = vld [vmem:[#allocation10 + $0x20] sm:$0xff] }
 0x170   :  { %2355 = vmatpush.bf16.msra.mxu2 %v3662_v22  ;;  %v1738_v22 = vperm.slane %v1734_v19, 2 }
 0x171   :  { %2344 = vmatpush.bf16.msra.mxu1 %v3502_v24 }
 0x172   :  { %2457 = vmatpush.bf16.msrb.mxu0 %v4197_v60  ;;  %v4210_v60 = vld [vmem:[#allocation10 + $0x18] sm:$0xff] }
 0x174   :  { %2356 = vmatpush.bf16.msra.mxu2 %v3646_v28  ;;  %2297 = vmatmul.bf16.vlgmr.msrb.gmra.mxu1 %v1637_v14 }
 0x175   :  { %2336 = vmatmul.bf16.vlgmr.msra.gmra.mxu0 %v1637_v14  ;;  %2375 = vmatmul.bf16.vlgmr.msra.gmra.mxu3 %v1637_v14  ;;  %v4205_v14 = vld [vmem:[#allocation8 + $0x30] sm:$0xff] }
 0x176   :  { %2345 = vmatpush.bf16.msra.mxu1 %v3486_v30 }
 0x178   :  { %2357 = vmatpush.bf16.msra.mxu2 %v3630_v33 }
 0x17a   :  { %2346 = vmatpush.bf16.msra.mxu1 %v3470_v37 }
 0x17b   :  { %2310 = vmatmul.bf16.vlgmr.msrb.gmra.mxu2 %v4545_v56 }
 0x17c   :  { %2358 = vmatpush.bf16.msra.mxu2 %v3614_v57 }
 0x17e   :  { %2347 = vmatpush.bf16.msra.mxu1 %v3454_v6 }
 0x180   :  { %2359 = vmatpush.bf16.msra.mxu2 %v3598_v43 }
 0x182   :  { %2348 = vmatpush.bf16.msra.mxu1 %v3438_v21 }
 0x184   :  { %2360 = vmatpush.bf16.msra.mxu2 %v3582_v49 }
 0x185   :  { %2349 = vmatmul.bf16.vlgmr.msra.gmra.mxu1 %v4545_v56  ;;  %v4196_v56 = vld [vmem:[%s4611_s5 + $0x28] sm:$0xff] }
 0x186   :  { %2458 = vmatpush.bf16.msrb.mxu0 %v4196_v56  ;;  %2539 = vmatpush.bf16.msrb.mxu1 %v4206_v13 }
 0x188   :  { %2361 = vmatpush.bf16.msra.mxu2 %v3566_v51  ;;  %v4200_v51 = vld [vmem:[#allocation8 + $0x8] sm:$0xff] }
 0x18a   :  { %2540 = vmatpush.bf16.msrb.mxu1 %v4205_v14 }
 0x18b   :  { %2362 = vmatmul.bf16.vlgmr.msra.gmra.mxu2 %v4558_v55  ;;  %v4195_v55 = vld [vmem:[%s4611_s5 + $0x20] sm:$0xff] }
 0x18c   :  { %2459 = vmatpush.bf16.msrb.mxu0 %v4195_v55 }
 0x18e   :  { %2541 = vmatpush.bf16.msrb.mxu1 %v4204_v48 }
 0x190   :  { %2460 = vmatpush.bf16.msrb.mxu0 %v4194_v0  ;;  %v4208_v0 = vld [vmem:[#allocation10 + $0x8] sm:$0xff] }
 0x192   :  { %2542 = vmatpush.bf16.msrb.mxu1 %v4203_v35 }
 0x194   :  { %2461 = vmatpush.bf16.msrb.mxu0 %v4193_v1  ;;  %v4228_v1 = vld [vmem:[%s4614_s8] ss:$0 sm:$0xff] }
 0x196   :  { %2543 = vmatpush.bf16.msrb.mxu1 %v4202_v29 }
 0x198   :  { %2462 = vmatpush.bf16.msrb.mxu0 %v4192_v7 }
 0x19a   :  { %2544 = vmatpush.bf16.msrb.mxu1 %v4201_v38 }
 0x19c   :  { %2463 = vmatpush.bf16.msrb.mxu0 %v4191_v9  ;;  %v4229_v9 = vld [vmem:[%s4616_s10] ss:$0 sm:$0xff] }
 0x19e   :  { %2545 = vmatpush.bf16.msrb.mxu1 %v4200_v51 }
 0x1c8   :  { %v2233_v52 = vpop.f32.mrf.mxu0 }
 0x1c9   :  { %v2234_v31 = vadd.f32 %v2233_v52, %v1736_v25  ;;  %v4199_v52 = vld [vmem:[#allocation8] sm:$0xff] }
 0x1ca   :  { %2546 = vmatpush.bf16.msrb.mxu1 %v4199_v52 }
 0x1ce   :  { %v2272_v16 = vpop.f32.mrf.mxu3 }
 0x1cf   :  { %v2273_v28 = vadd.f32 %v2272_v16, %v1737_v2  ;;  %v4214_v16 = vld [vmem:[#allocation10 + $0x38] sm:$0xff] }
 0x1d0   :  { %v2235_v54 = vpop.f32.mrf.mxu0  ;;  %2622 = vmatpush.bf16.msrb.mxu2 %v4214_v16 }
 0x1d1   :  { %v4213_v54 = vld [vmem:[#allocation10 + $0x30] sm:$0xff] }
 0x1d4   :  { %2623 = vmatpush.bf16.msrb.mxu2 %v4213_v54 }
 0x1d6   :  { %v2274_v58 = vpop.f32.mrf.mxu3 }
 0x1d7   :  { %v4212_v58 = vld [vmem:[#allocation10 + $0x28] sm:$0xff] }
 0x1d8   :  { %2624 = vmatpush.bf16.msrb.mxu2 %v4212_v58 }
 0x1dc   :  { %2625 = vmatpush.bf16.msrb.mxu2 %v4211_v59 }
 0x1e0   :  { %2626 = vmatpush.bf16.msrb.mxu2 %v4210_v60 }
 0x1e1   :  { %v2246_v40 = vpop.f32.mrf.mxu1  ;;  %v2285_v47 = vpop.f32.mrf.mxu0 }
 0x1e2   :  { %v2286_v32 = vadd.f32 %v2285_v47, %v2273_v28  ;;  %v2247_v34 = vadd.f32 %v2246_v40, %v2234_v31  ;;  %v4209_v40 = vld [vmem:[#allocation10 + $0x10] sm:$0xff]  ;;  %v4227_v47 = vld [vmem:[%s4612_s6] ss:$0 sm:$0xff] }
 0x1e4   :  { %2627 = vmatpush.bf16.msrb.mxu2 %v4209_v40 }
 0x1e8   :  { %v2324_v61 = vpop.f32.mrf.mxu3  ;;  %2628 = vmatpush.bf16.msrb.mxu2 %v4208_v0 }
 0x1e9   :  { %v2248_v62 = vpop.f32.mrf.mxu1  ;;  %v2287_v63 = vpop.f32.mrf.mxu0 }
 0x1ee   :  { %v2259_v41 = vpop.f32.mrf.mxu2 }
 0x1ef   :  { %v2260_v57 = vadd.f32 %v2259_v41, %v2247_v34  ;;  %v4207_v41 = vld [vmem:[#allocation10] sm:$0xff] }
 0x1f0   :  { %v2326_v3 = vpop.f32.mrf.mxu3  ;;  %2629 = vmatpush.bf16.msrb.mxu2 %v4207_v41 }
 0x1f1   :  { %v2298_v4 = vpop.f32.mrf.mxu1  ;;  %v2380_v23 = vmax.f32 %v2260_v57, 0.0 }
 0x1f2   :  { %v2337_v5 = vpop.f32.mrf.mxu0  ;;  %v2299_v36 = vadd.f32 %v2298_v4, %v2286_v32 }
 0x1f4   :  { %v2381_v6 = vmax.f32 %v2299_v36, 0.0 }
 0x1f6   :  { %v2261_v8 = vpop.f32.mrf.mxu2  ;;  %v2384_v46 = vmax.f32 %v2380_v23, %v2381_v6 }
 0x1f8   :  { %v2376_v10 = vpop.f32.mrf.mxu3 }
 0x1f9   :  { %v2300_v11 = vpop.f32.mrf.mxu1 }
 0x1fa   :  { %v2339_v12 = vpop.f32.mrf.mxu0 }
 0x1fe   :  { %v2311_v17 = vpop.f32.mrf.mxu2 }
 0x1ff   :  { %v2312_v27 = vadd.f32 %v2311_v17, %v1738_v22 }
 0x200   :  { %v2378_v18 = vpop.f32.mrf.mxu3 }
 0x201   :  { %v2325_v33 = vadd.f32 %v2324_v61, %v2312_v27 }
 0x202   :  { %v2350_v20 = vpop.f32.mrf.mxu1 }
 0x203   :  { %v2351_v37 = vadd.f32 %v2350_v20, %v1739_v53  ;;  %v2338_v15 = vadd.f32 %v2337_v5, %v2325_v33 }
 0x205   :  { %v2382_v43 = vmax.f32 %v2338_v15, 0.0 }
 0x206   :  { %v2313_v24 = vpop.f32.mrf.mxu2 }
 0x20a   :  { %v2352_v30 = vpop.f32.mrf.mxu1 }
 0x20e   :  { %v2363_v44 = vpop.f32.mrf.mxu2 }
 0x20f   :  { %v2364_v39 = vadd.f32 %v2363_v44, %v2351_v37 }
 0x211   :  { %v2377_v42 = vadd.f32 %v2376_v10, %v2364_v39 }
 0x213   :  { %v2383_v45 = vmax.f32 %v2377_v42, 0.0 }
 0x215   :  { %v2385_v21 = vmax.f32 %v2382_v43, %v2383_v45 }
 0x216   :  { %v2365_v49 = vpop.f32.mrf.mxu2 }
 0x217   :  { %v2386_v50 = vmax.f32 %v2384_v46, %v2385_v21 }
 0x219   :  { %v2387_v26 = vpack.c.bf16 %v2386_v50, %v2386_v50 }
 0x21b   :  { %2464 = vmatmul.bf16.vlgmr.msrb.gmra.mxu0 %v2387_v26 }
 0x298   :  { %v2465_v56 = vpop.f32.mrf.mxu0 }
 0x299   :  { %v2466_v55 = vadd.f32 %v4227_v47, %v2465_v56 }
 0x29b   :  { %v2469_v61 = vmax.f32 %v2466_v55, 0.0 }
 0x29d   :  { %v2470_v62 = vpack.c.bf16 %v2469_v61, %v2469_v61 }
 0x29f   :  { %2547 = vmatmul.bf16.vlgmr.msrb.gmra.mxu1 %v2470_v62 }
 0x2a0   :  { %v2467_v63 = vpop.f32.mrf.mxu0 }
 0x31c   :  { %v2548_v3 = vpop.f32.mrf.mxu1 }
 0x31d   :  { %v2549_v4 = vadd.f32 %v4228_v1, %v2548_v3 }
 0x31f   :  { %v2552_v5 = vmax.f32 %v2549_v4, 0.0 }
 0x321   :  { %v2553_v7 = vpack.c.bf16 %v2552_v5, %v2552_v5 }
 0x323   :  { %2630 = vmatmul.bf16.vlgmr.msrb.gmra.mxu2 %v2553_v7 }
 0x324   :  { %v2550_v8 = vpop.f32.mrf.mxu1 }
 0x3a6   :  { %v2631_v10 = vpop.f32.mrf.mxu2 }
 0x3a7   :  { %v2632_v11 = vadd.f32 %v4229_v9, %v2631_v10 }
 0x3a9   :  { %2635 = vst [vmem:[#allocation11] sm:$0x3] %v2632_v11 }
 0x3aa   :  { %2646 = dma.vmem_to_hbm [thread:$0]  %s2642_s25, 32, %s2644_s0, [#allocation4]  }
 0x3ae   :  { %v2633_v12 = vpop.f32.mrf.mxu2 }
 0x3af   :  { %4382 = dma.done.wait [#allocation4], 32  }
 0x3b0   :  { %4383 = vsyncadd [#allocation4], 4294967264 }
 0x3b1   :  { %2651 = vsyncpa [#allocation3], 1 }
 0x3b2   :  { %2652 = vsyncpa [#allocation6], 1 }
 0x3b3   :  { %2653 = vsyncpa [#allocation9], 1 }
 0x3b4   :  { %2654 = vsyncpa [#allocation4], 1 }

</bundles_post_ra>
